<compile_context>
chip_gen: v5e
topology: v5e:2x2
jax: 0.10.0
libtpu: 0.0.40
codegen_flags: <defaults>
</compile_context>

<pallas_src>
import functools

import jax
import jax.numpy as jnp
from jax.experimental import pallas as pl
from jax.experimental.pallas import tpu as pltpu


def _round_up(x, m):
    return (x + m - 1) // m * m


# ---------------------------------------------------------------------------
# Fused kernel: embedding gather + GRU cell (step 0) + vocab-tiled decoder
# ---------------------------------------------------------------------------

def _fused_gru_decoder_kernel(E, tokens_ref,
                              emb_hbm, h_ref, wih_ref, whh_ref, bih_ref, bhh_ref,
                              wdec_ref, bdec_ref,
                              logits_ref, hout_ref,
                              x_vmem, h_vmem, sem):
    """One vocab tile per grid step; GRU runs once at step 0 into VMEM scratch.

    tokens_ref : SMEM [Bp] int32 (scalar prefetch)
    emb_hbm    : HBM  [V, Ep] f32 (memory_space=pl.ANY)
    h_ref      : VMEM [Bp, Ep] f32
    wih_ref    : VMEM [Ep, 3Ep] bf16   (r|z|n column blocks)
    whh_ref    : VMEM [Ep, 3Ep] f32    (recurrent path kept in f32)
    bih/bhh    : VMEM [1, 3Ep]  f32
    wdec_ref   : VMEM [Ep, tile_v] bf16 (pipelined over the vocab grid axis)
    bdec_ref   : VMEM [1, tile_v]  f32
    logits_ref : VMEM [Bp, tile_v] f32 (output tile)
    hout_ref   : VMEM [Bp, Ep] f32     (output, resident across grid)
    """
    j = pl.program_id(0)
    Bp, Ep = h_ref.shape

    @pl.when(j == 0)
    def _gru_step():
        # --- embedding gather: one row DMA per batch element from HBM -------
        copies = []
        for b in range(Bp):
            cp = pltpu.make_async_copy(emb_hbm.at[pl.ds(tokens_ref[b], 1)],
                                       x_vmem.at[pl.ds(b, 1)],
                                       sem.at[b])
            cp.start()
            copies.append(cp)
        for cp in copies:
            cp.wait()

        # --- GRU cell: two fused gate matmuls, f32 accumulation -------------
        x = x_vmem[...]
        h = h_ref[...]
        gi = jnp.dot(x.astype(wih_ref.dtype), wih_ref[...],
                     preferred_element_type=jnp.float32) + bih_ref[...]
        gh = jnp.dot(h, whh_ref[...],
                     preferred_element_type=jnp.float32) + bhh_ref[...]
        # Gate slices land on 128-aligned lane boundaries (Ep multiple of 128).
        r = jax.nn.sigmoid(gi[:, :Ep] + gh[:, :Ep])
        z = jax.nn.sigmoid(gi[:, Ep:2 * Ep] + gh[:, Ep:2 * Ep])
        n = jnp.tanh(gi[:, 2 * Ep:] + r * gh[:, 2 * Ep:])
        h_new = (1.0 - z) * n + z * h
        # Explicitly zero the padded lanes so the decoder never sees garbage,
        # even if a caller hands in a hidden state with non-zero padding.
        lane = jax.lax.broadcasted_iota(jnp.int32, (Bp, Ep), 1)
        h_new = jnp.where(lane < E, h_new, 0.0)
        h_vmem[...] = h_new
        hout_ref[...] = h_new

    # --- decoder vocab tile: [Bp,Ep] @ [Ep,tile_v] + bias -------------------
    logits = jnp.dot(h_vmem[...].astype(wdec_ref.dtype), wdec_ref[...],
                     preferred_element_type=jnp.float32) + bdec_ref[...]
    logits_ref[...] = logits.astype(logits_ref.dtype)


# ---------------------------------------------------------------------------
# One-time parameter packing (outside the hot path)
# ---------------------------------------------------------------------------

def pack_params(params, weights_dtype=jnp.bfloat16,
                tile_v_budget_bytes=8 * 1024 * 1024):
    """Repack PyTorch-layout params into MXU-friendly, lane-dense layouts.

    Done once; the jitted forward never transposes/slices weights.
    Returns (packed_dict, tile_v).
    """
    emb = params["encoder_target"]
    V, E = emb.shape
    Ep = _round_up(E, 128)
    Vp = _round_up(V, 128)
    itemsize = jnp.dtype(weights_dtype).itemsize

    # tile_v: largest multiple of 128 that (a) fits the per-tile VMEM budget
    # and (b) exactly divides Vp, so no zero-weight columns are streamed.
    m = Vp // 128
    cap_blocks = max(1, tile_v_budget_bytes // (Ep * itemsize * 128))
    if m <= cap_blocks:
        tile_blocks = m
    else:
        tile_blocks = max(d for d in range(1, cap_blocks + 1) if m % d == 0)
    tile_v = int(tile_blocks * 128)

    def pad2(a, rows, cols):
        return jnp.pad(a, ((0, rows - a.shape[0]), (0, cols - a.shape[1])))

    def gate_blocks(w, dtype):  # [3E,E] (r,z,n) -> [Ep,3Ep] transposed, padded
        blocks = [pad2(w[g * E:(g + 1) * E].T, Ep, Ep) for g in range(3)]
        return jnp.concatenate(blocks, axis=1).astype(dtype)

    def gate_bias(b):           # [3E] -> [1, 3Ep]
        blocks = [jnp.pad(b[g * E:(g + 1) * E], (0, Ep - E)) for g in range(3)]
        return jnp.concatenate(blocks)[None, :].astype(jnp.float32)

    packed = {
        "emb":  jnp.pad(emb, ((0, 0), (0, Ep - E))).astype(jnp.float32),   # [V, Ep]
        "w_ih": gate_blocks(params["weight_ih_l0"], weights_dtype),        # [Ep,3Ep]
        "w_hh": gate_blocks(params["weight_hh_l0"], jnp.float32),          # f32 recurrent
        "b_ih": gate_bias(params["bias_ih_l0"]),                           # [1,3Ep]
        "b_hh": gate_bias(params["bias_hh_l0"]),                           # [1,3Ep]
        "wdec": pad2(params["decoder_w"].T, Ep, Vp).astype(weights_dtype), # [Ep,Vp]
        "bdec": jnp.pad(params["decoder_b"],
                        (0, Vp - V))[None, :].astype(jnp.float32),         # [1,Vp]
    }
    packed = jax.device_put(packed)
    return packed, tile_v


# ---------------------------------------------------------------------------
# Forward pass
# ---------------------------------------------------------------------------

def word_rnn_forward(tokens, hidden, packed, *, tile_v):
    """Pallas-backed WordRNN.forward (GRU, n_layers=1, seq_len=1).

    tokens: int32 [B]; hidden: f32 [1, B, E].
    Returns (logits [B, V], hidden [1, B, E]).
    """
    emb = packed["emb"]
    V, Ep = emb.shape
    Vp = packed["wdec"].shape[1]
    n_tiles = Vp // tile_v
    B = tokens.shape[0]
    E = hidden.shape[-1]
    Bp = _round_up(B, 8)

    tokens_p = jnp.pad(tokens.astype(jnp.int32), (0, Bp - B))
    h_pad = jnp.pad(hidden[0].astype(jnp.float32), ((0, Bp - B), (0, Ep - E)))

    wdec_bytes = jnp.dtype(packed["wdec"].dtype).itemsize
    wih_bytes = jnp.dtype(packed["w_ih"].dtype).itemsize

    # Explicit VMEM limit: double-buffered inputs/outputs + scratch, with
    # headroom.  >=32 MiB so larger decoder tiles work on v5e's 16 MiB default;
    # capped at 64 MiB to stay inside v7x's physical VMEM.
    est = (2 * Ep * 3 * Ep * (wih_bytes + 4)     # w_ih (bf16) + w_hh (f32), 2 bufs
           + 2 * 2 * 3 * Ep * 4                  # biases
           + 2 * Ep * tile_v * wdec_bytes        # decoder weight tiles, 2 bufs
           + 2 * tile_v * 4                      # decoder bias tiles
           + 2 * Bp * tile_v * 4                 # logits tiles
           + 4 * Bp * Ep * 4                     # h in / h out
           + 3 * Bp * Ep * 4)                    # scratch
    vmem_limit = int(min(64 * 1024 * 1024, max(32 * 1024 * 1024, 1.5 * est)))

    cost = pl.CostEstimate(
        flops=int(2 * Bp * Ep * (2 * 3 * Ep + Vp)),
        transcendentals=int(3 * Bp * Ep),
        bytes_accessed=int(Ep * 3 * Ep * (wih_bytes + 4) + Ep * Vp * wdec_bytes
                           + 2 * 3 * Ep * 4 + Vp * 4
                           + 3 * Bp * Ep * 4 + Bp * Vp * 4),
    )

    grid_spec = pltpu.PrefetchScalarGridSpec(
        num_scalar_prefetch=1,                    # tokens -> SMEM
        grid=(n_tiles,),
        in_specs=[
            pl.BlockSpec(memory_space=pl.ANY),                   # emb table (HBM)
            pl.BlockSpec((Bp, Ep), lambda j, tok: (0, 0)),       # h (resident)
            pl.BlockSpec((Ep, 3 * Ep), lambda j, tok: (0, 0)),   # w_ih (resident)
            pl.BlockSpec((Ep, 3 * Ep), lambda j, tok: (0, 0)),   # w_hh (resident)
            pl.BlockSpec((1, 3 * Ep), lambda j, tok: (0, 0)),    # b_ih
            pl.BlockSpec((1, 3 * Ep), lambda j, tok: (0, 0)),    # b_hh
            pl.BlockSpec((Ep, tile_v), lambda j, tok: (0, j)),   # decoder W tile
            pl.BlockSpec((1, tile_v), lambda j, tok: (0, j)),    # decoder b tile
        ],
        out_specs=[
            pl.BlockSpec((Bp, tile_v), lambda j, tok: (0, j)),   # logits tile
            pl.BlockSpec((Bp, Ep), lambda j, tok: (0, 0)),       # h_new (resident)
        ],
        scratch_shapes=[
            pltpu.VMEM((Bp, Ep), jnp.float32),   # gathered embeddings
            pltpu.VMEM((Bp, Ep), jnp.float32),   # h_new, shared by all vocab tiles
            pltpu.SemaphoreType.DMA((Bp,)),      # per-row gather DMAs
        ],
    )

    logits_pad, h_new_pad = pl.pallas_call(
        functools.partial(_fused_gru_decoder_kernel, E),
        out_shape=(jax.ShapeDtypeStruct((Bp, Vp), jnp.float32),
                   jax.ShapeDtypeStruct((Bp, Ep), jnp.float32)),
        grid_spec=grid_spec,
        compiler_params=pltpu.CompilerParams(
            # "arbitrary": every vocab tile reads the step-0 VMEM scratch, so
            # this axis must stay on one core / in order under fusion.
            dimension_semantics=("arbitrary",),
            vmem_limit_bytes=vmem_limit),
        cost_estimate=cost,
    )(tokens_p, emb, h_pad, packed["w_ih"], packed["w_hh"],
      packed["b_ih"], packed["b_hh"], packed["wdec"], packed["bdec"])

    logits = logits_pad[:B, :V]
    h_out = h_new_pad[:B, :E][None]              # back to [n_layers=1, B, E]
    return logits, h_out


# ---------------------------------------------------------------------------
# Pure-JAX reference + init
# ---------------------------------------------------------------------------

def _reference_forward(tokens, hidden, params):
    E = params["encoder_target"].shape[1]
    x = jnp.take(params["encoder_target"], tokens, axis=0)
    h = hidden[0]
    gi = x @ params["weight_ih_l0"].T + params["bias_ih_l0"]
    gh = h @ params["weight_hh_l0"].T + params["bias_hh_l0"]
    r = jax.nn.sigmoid(gi[:, :E] + gh[:, :E])
    z = jax.nn.sigmoid(gi[:, E:2 * E] + gh[:, E:2 * E])
    n = jnp.tanh(gi[:, 2 * E:] + r * gh[:, 2 * E:])
    h_new = (1.0 - z) * n + z * h
    logits = h_new @ params["decoder_w"].T + params["decoder_b"]
    return logits, h_new[None]


def init_params(key, vocab_size, embedding_size):
    """Deterministic parameter init mirroring the PyTorch module's shapes."""
    E, V = embedding_size, vocab_size
    ks = jax.random.split(key, 8)
    k_rnn = 1.0 / jnp.sqrt(E)
    k_dec = 1.0 / jnp.sqrt(E)
    u = lambda k, shape, bound: jax.random.uniform(
        k, shape, jnp.float32, minval=-bound, maxval=bound)
    return {
        "encoder_target": jax.random.normal(ks[0], (V, E), jnp.float32),
        "encoder_context": jax.random.normal(ks[1], (V, E), jnp.float32),
        "weight_ih_l0": u(ks[2], (3 * E, E), k_rnn),
        "weight_hh_l0": u(ks[3], (3 * E, E), k_rnn),
        "bias_ih_l0": u(ks[4], (3 * E,), k_rnn),
        "bias_hh_l0": u(ks[5], (3 * E,), k_rnn),
        "decoder_w": u(ks[6], (V, E), k_dec),
        "decoder_b": u(ks[7], (V,), k_dec),
    }


if __name__ == "__main__":
    vocab_size = 64
    embedding_size = 32
    batch_size = 2
    n_layers = 1

    key = jax.random.PRNGKey(0)
    kp, kt = jax.random.split(key)
    params = init_params(kp, vocab_size, embedding_size)

    # One-time packing outside the hot path (fused, pre-transposed, padded,
    # bf16 weights except f32 recurrent W_hh).
    packed, tile_v = pack_params(params, weights_dtype=jnp.bfloat16)

    tokens = jax.random.randint(kt, (batch_size,), 0, vocab_size, dtype=jnp.int32)
    hidden0 = jnp.zeros((n_layers, batch_size, embedding_size), jnp.float32)

    fwd = jax.jit(functools.partial(word_rnn_forward, tile_v=tile_v))
    logits, hidden1 = fwd(tokens, hidden0, packed)
    jax.block_until_ready((logits, hidden1))

    ref_logits, ref_hidden = _reference_forward(tokens, hidden0, params)
    assert logits.shape == (batch_size, vocab_size)
    assert hidden1.shape == (n_layers, batch_size, embedding_size)
    # bf16 input/decoder weights with f32 accumulation -> allow a few e-3 drift.
    assert jnp.allclose(logits, ref_logits, atol=2e-2, rtol=2e-2), \
        float(jnp.max(jnp.abs(logits - ref_logits)))
    assert jnp.allclose(hidden1, ref_hidden, atol=2e-2, rtol=2e-2), \
        float(jnp.max(jnp.abs(hidden1 - ref_hidden)))

    print("KERNEL_OK")
</pallas_src>

<mosaic_0001>
module attributes {stable_mosaic.version = 11 : i64} {
  func.func @_fused_gru_decoder_kernel(%arg0: i32, %arg1: memref<8xi32, #tpu.memory_space<smem>>, %arg2: memref<64x128xf32, #tpu.memory_space<any>>, %arg3: memref<8x128xf32, #tpu.memory_space<vmem>>, %arg4: memref<128x384xbf16, #tpu.memory_space<vmem>>, %arg5: memref<128x384xf32, #tpu.memory_space<vmem>>, %arg6: memref<1x384xf32, #tpu.memory_space<vmem>>, %arg7: memref<1x384xf32, #tpu.memory_space<vmem>>, %arg8: memref<128x128xbf16, #tpu.memory_space<vmem>>, %arg9: memref<1x128xf32, #tpu.memory_space<vmem>>, %arg10: memref<8x128xf32, #tpu.memory_space<vmem>>, %arg11: memref<8x128xf32, #tpu.memory_space<vmem>>, %arg12: memref<8x128xf32, #tpu.memory_space<vmem>>, %arg13: memref<8x128xf32, #tpu.memory_space<vmem>>, %arg14: memref<8x!tpu.dma_semaphore, #tpu.memory_space<semaphore_mem>>) attributes {dimension_semantics = [#tpu.dimension_semantics<arbitrary>], iteration_bounds = array<i64: 1>, scalar_prefetch = 1 : i64, scratch_operands = 3 : i64, tpu.core_type = #tpu.core_type<tc>, window_params = [{}, {pipeline_mode = #tpu.pipeline_mode<synchronous>, transform_indices = @transform_1, window_bounds = array<i64: 8, 128>}, {pipeline_mode = #tpu.pipeline_mode<synchronous>, transform_indices = @transform_2, window_bounds = array<i64: 128, 384>}, {pipeline_mode = #tpu.pipeline_mode<synchronous>, transform_indices = @transform_3, window_bounds = array<i64: 128, 384>}, {pipeline_mode = #tpu.pipeline_mode<synchronous>, transform_indices = @transform_4, window_bounds = array<i64: 1, 384>}, {pipeline_mode = #tpu.pipeline_mode<synchronous>, transform_indices = @transform_5, window_bounds = array<i64: 1, 384>}, {transform_indices = @transform_6, window_bounds = array<i64: 128, 128>}, {transform_indices = @transform_7, window_bounds = array<i64: 1, 128>}, {transform_indices = @transform_8, window_bounds = array<i64: 8, 128>}, {pipeline_mode = #tpu.pipeline_mode<synchronous>, transform_indices = @transform_9, window_bounds = array<i64: 8, 128>}]} {
    %c0_i32 = arith.constant 0 : i32
    %0 = arith.cmpi eq, %arg0, %c0_i32 : i32
    %1 = arith.extui %0 : i1 to i32
    %c0_i32_0 = arith.constant 0 : i32
    %2 = arith.cmpi ne, %1, %c0_i32_0 : i32
    scf.if %2 {
      %c0_8 = arith.constant 0 : index
      %11 = memref.load %arg1[%c0_8] : memref<8xi32, #tpu.memory_space<smem>>
      %c0_i32_9 = arith.constant 0 : i32
      %c0_i32_10 = arith.constant 0 : i32
      %12 = tpu.memref_slice %arg2[%11, %c0_i32_10] : memref<64x128xf32, #tpu.memory_space<any>> -> memref<1x128xf32, #tpu.memory_space<any>>
      %c0_i32_11 = arith.constant 0 : i32
      %c0_i32_12 = arith.constant 0 : i32
      %13 = tpu.memref_slice %arg12[%c0_i32_11, %c0_i32_12] : memref<8x128xf32, #tpu.memory_space<vmem>> -> memref<1x128xf32, #tpu.memory_space<vmem>>
      %14 = tpu.memref_slice %arg14[%c0_i32_9] : memref<8x!tpu.dma_semaphore, #tpu.memory_space<semaphore_mem>> -> memref<1x!tpu.dma_semaphore, #tpu.memory_space<semaphore_mem>>
      %15 = tpu.memref_squeeze %14 : memref<1x!tpu.dma_semaphore, #tpu.memory_space<semaphore_mem>> -> memref<!tpu.dma_semaphore, #tpu.memory_space<semaphore_mem>>
      tpu.enqueue_dma source(%12 : memref<1x128xf32, #tpu.memory_space<any>>) target(%13 : memref<1x128xf32, #tpu.memory_space<vmem>>) target_semaphore(%15 : memref<!tpu.dma_semaphore, #tpu.memory_space<semaphore_mem>>)
      %c1 = arith.constant 1 : index
      %16 = memref.load %arg1[%c1] : memref<8xi32, #tpu.memory_space<smem>>
      %c1_i32 = arith.constant 1 : i32
      %c0_i32_13 = arith.constant 0 : i32
      %17 = tpu.memref_slice %arg2[%16, %c0_i32_13] : memref<64x128xf32, #tpu.memory_space<any>> -> memref<1x128xf32, #tpu.memory_space<any>>
      %c1_i32_14 = arith.constant 1 : i32
      %c0_i32_15 = arith.constant 0 : i32
      %18 = tpu.memref_slice %arg12[%c1_i32_14, %c0_i32_15] : memref<8x128xf32, #tpu.memory_space<vmem>> -> memref<1x128xf32, #tpu.memory_space<vmem>>
      %19 = tpu.memref_slice %arg14[%c1_i32] : memref<8x!tpu.dma_semaphore, #tpu.memory_space<semaphore_mem>> -> memref<1x!tpu.dma_semaphore, #tpu.memory_space<semaphore_mem>>
      %20 = tpu.memref_squeeze %19 : memref<1x!tpu.dma_semaphore, #tpu.memory_space<semaphore_mem>> -> memref<!tpu.dma_semaphore, #tpu.memory_space<semaphore_mem>>
      tpu.enqueue_dma source(%17 : memref<1x128xf32, #tpu.memory_space<any>>) target(%18 : memref<1x128xf32, #tpu.memory_space<vmem>>) target_semaphore(%20 : memref<!tpu.dma_semaphore, #tpu.memory_space<semaphore_mem>>)
      %c2 = arith.constant 2 : index
      %21 = memref.load %arg1[%c2] : memref<8xi32, #tpu.memory_space<smem>>
      %c2_i32 = arith.constant 2 : i32
      %c0_i32_16 = arith.constant 0 : i32
      %22 = tpu.memref_slice %arg2[%21, %c0_i32_16] : memref<64x128xf32, #tpu.memory_space<any>> -> memref<1x128xf32, #tpu.memory_space<any>>
      %c2_i32_17 = arith.constant 2 : i32
      %c0_i32_18 = arith.constant 0 : i32
      %23 = tpu.memref_slice %arg12[%c2_i32_17, %c0_i32_18] : memref<8x128xf32, #tpu.memory_space<vmem>> -> memref<1x128xf32, #tpu.memory_space<vmem>>
      %24 = tpu.memref_slice %arg14[%c2_i32] : memref<8x!tpu.dma_semaphore, #tpu.memory_space<semaphore_mem>> -> memref<1x!tpu.dma_semaphore, #tpu.memory_space<semaphore_mem>>
      %25 = tpu.memref_squeeze %24 : memref<1x!tpu.dma_semaphore, #tpu.memory_space<semaphore_mem>> -> memref<!tpu.dma_semaphore, #tpu.memory_space<semaphore_mem>>
      tpu.enqueue_dma source(%22 : memref<1x128xf32, #tpu.memory_space<any>>) target(%23 : memref<1x128xf32, #tpu.memory_space<vmem>>) target_semaphore(%25 : memref<!tpu.dma_semaphore, #tpu.memory_space<semaphore_mem>>)
      %c3 = arith.constant 3 : index
      %26 = memref.load %arg1[%c3] : memref<8xi32, #tpu.memory_space<smem>>
      %c3_i32 = arith.constant 3 : i32
      %c0_i32_19 = arith.constant 0 : i32
      %27 = tpu.memref_slice %arg2[%26, %c0_i32_19] : memref<64x128xf32, #tpu.memory_space<any>> -> memref<1x128xf32, #tpu.memory_space<any>>
      %c3_i32_20 = arith.constant 3 : i32
      %c0_i32_21 = arith.constant 0 : i32
      %28 = tpu.memref_slice %arg12[%c3_i32_20, %c0_i32_21] : memref<8x128xf32, #tpu.memory_space<vmem>> -> memref<1x128xf32, #tpu.memory_space<vmem>>
      %29 = tpu.memref_slice %arg14[%c3_i32] : memref<8x!tpu.dma_semaphore, #tpu.memory_space<semaphore_mem>> -> memref<1x!tpu.dma_semaphore, #tpu.memory_space<semaphore_mem>>
      %30 = tpu.memref_squeeze %29 : memref<1x!tpu.dma_semaphore, #tpu.memory_space<semaphore_mem>> -> memref<!tpu.dma_semaphore, #tpu.memory_space<semaphore_mem>>
      tpu.enqueue_dma source(%27 : memref<1x128xf32, #tpu.memory_space<any>>) target(%28 : memref<1x128xf32, #tpu.memory_space<vmem>>) target_semaphore(%30 : memref<!tpu.dma_semaphore, #tpu.memory_space<semaphore_mem>>)
      %c4 = arith.constant 4 : index
      %31 = memref.load %arg1[%c4] : memref<8xi32, #tpu.memory_space<smem>>
      %c4_i32 = arith.constant 4 : i32
      %c0_i32_22 = arith.constant 0 : i32
      %32 = tpu.memref_slice %arg2[%31, %c0_i32_22] : memref<64x128xf32, #tpu.memory_space<any>> -> memref<1x128xf32, #tpu.memory_space<any>>
      %c4_i32_23 = arith.constant 4 : i32
      %c0_i32_24 = arith.constant 0 : i32
      %33 = tpu.memref_slice %arg12[%c4_i32_23, %c0_i32_24] : memref<8x128xf32, #tpu.memory_space<vmem>> -> memref<1x128xf32, #tpu.memory_space<vmem>>
      %34 = tpu.memref_slice %arg14[%c4_i32] : memref<8x!tpu.dma_semaphore, #tpu.memory_space<semaphore_mem>> -> memref<1x!tpu.dma_semaphore, #tpu.memory_space<semaphore_mem>>
      %35 = tpu.memref_squeeze %34 : memref<1x!tpu.dma_semaphore, #tpu.memory_space<semaphore_mem>> -> memref<!tpu.dma_semaphore, #tpu.memory_space<semaphore_mem>>
      tpu.enqueue_dma source(%32 : memref<1x128xf32, #tpu.memory_space<any>>) target(%33 : memref<1x128xf32, #tpu.memory_space<vmem>>) target_semaphore(%35 : memref<!tpu.dma_semaphore, #tpu.memory_space<semaphore_mem>>)
      %c5 = arith.constant 5 : index
      %36 = memref.load %arg1[%c5] : memref<8xi32, #tpu.memory_space<smem>>
      %c5_i32 = arith.constant 5 : i32
      %c0_i32_25 = arith.constant 0 : i32
      %37 = tpu.memref_slice %arg2[%36, %c0_i32_25] : memref<64x128xf32, #tpu.memory_space<any>> -> memref<1x128xf32, #tpu.memory_space<any>>
      %c5_i32_26 = arith.constant 5 : i32
      %c0_i32_27 = arith.constant 0 : i32
      %38 = tpu.memref_slice %arg12[%c5_i32_26, %c0_i32_27] : memref<8x128xf32, #tpu.memory_space<vmem>> -> memref<1x128xf32, #tpu.memory_space<vmem>>
      %39 = tpu.memref_slice %arg14[%c5_i32] : memref<8x!tpu.dma_semaphore, #tpu.memory_space<semaphore_mem>> -> memref<1x!tpu.dma_semaphore, #tpu.memory_space<semaphore_mem>>
      %40 = tpu.memref_squeeze %39 : memref<1x!tpu.dma_semaphore, #tpu.memory_space<semaphore_mem>> -> memref<!tpu.dma_semaphore, #tpu.memory_space<semaphore_mem>>
      tpu.enqueue_dma source(%37 : memref<1x128xf32, #tpu.memory_space<any>>) target(%38 : memref<1x128xf32, #tpu.memory_space<vmem>>) target_semaphore(%40 : memref<!tpu.dma_semaphore, #tpu.memory_space<semaphore_mem>>)
      %c6 = arith.constant 6 : index
      %41 = memref.load %arg1[%c6] : memref<8xi32, #tpu.memory_space<smem>>
      %c6_i32 = arith.constant 6 : i32
      %c0_i32_28 = arith.constant 0 : i32
      %42 = tpu.memref_slice %arg2[%41, %c0_i32_28] : memref<64x128xf32, #tpu.memory_space<any>> -> memref<1x128xf32, #tpu.memory_space<any>>
      %c6_i32_29 = arith.constant 6 : i32
      %c0_i32_30 = arith.constant 0 : i32
      %43 = tpu.memref_slice %arg12[%c6_i32_29, %c0_i32_30] : memref<8x128xf32, #tpu.memory_space<vmem>> -> memref<1x128xf32, #tpu.memory_space<vmem>>
      %44 = tpu.memref_slice %arg14[%c6_i32] : memref<8x!tpu.dma_semaphore, #tpu.memory_space<semaphore_mem>> -> memref<1x!tpu.dma_semaphore, #tpu.memory_space<semaphore_mem>>
      %45 = tpu.memref_squeeze %44 : memref<1x!tpu.dma_semaphore, #tpu.memory_space<semaphore_mem>> -> memref<!tpu.dma_semaphore, #tpu.memory_space<semaphore_mem>>
      tpu.enqueue_dma source(%42 : memref<1x128xf32, #tpu.memory_space<any>>) target(%43 : memref<1x128xf32, #tpu.memory_space<vmem>>) target_semaphore(%45 : memref<!tpu.dma_semaphore, #tpu.memory_space<semaphore_mem>>)
      %c7 = arith.constant 7 : index
      %46 = memref.load %arg1[%c7] : memref<8xi32, #tpu.memory_space<smem>>
      %c7_i32 = arith.constant 7 : i32
      %c0_i32_31 = arith.constant 0 : i32
      %47 = tpu.memref_slice %arg2[%46, %c0_i32_31] : memref<64x128xf32, #tpu.memory_space<any>> -> memref<1x128xf32, #tpu.memory_space<any>>
      %c7_i32_32 = arith.constant 7 : i32
      %c0_i32_33 = arith.constant 0 : i32
      %48 = tpu.memref_slice %arg12[%c7_i32_32, %c0_i32_33] : memref<8x128xf32, #tpu.memory_space<vmem>> -> memref<1x128xf32, #tpu.memory_space<vmem>>
      %49 = tpu.memref_slice %arg14[%c7_i32] : memref<8x!tpu.dma_semaphore, #tpu.memory_space<semaphore_mem>> -> memref<1x!tpu.dma_semaphore, #tpu.memory_space<semaphore_mem>>
      %50 = tpu.memref_squeeze %49 : memref<1x!tpu.dma_semaphore, #tpu.memory_space<semaphore_mem>> -> memref<!tpu.dma_semaphore, #tpu.memory_space<semaphore_mem>>
      tpu.enqueue_dma source(%47 : memref<1x128xf32, #tpu.memory_space<any>>) target(%48 : memref<1x128xf32, #tpu.memory_space<vmem>>) target_semaphore(%50 : memref<!tpu.dma_semaphore, #tpu.memory_space<semaphore_mem>>)
      %c0_i32_34 = arith.constant 0 : i32
      %c0_i32_35 = arith.constant 0 : i32
      %51 = tpu.memref_slice %arg2[%11, %c0_i32_35] : memref<64x128xf32, #tpu.memory_space<any>> -> memref<1x128xf32, #tpu.memory_space<any>>
      %c0_i32_36 = arith.constant 0 : i32
      %c0_i32_37 = arith.constant 0 : i32
      %52 = tpu.memref_slice %arg12[%c0_i32_36, %c0_i32_37] : memref<8x128xf32, #tpu.memory_space<vmem>> -> memref<1x128xf32, #tpu.memory_space<vmem>>
      %53 = tpu.memref_slice %arg14[%c0_i32_34] : memref<8x!tpu.dma_semaphore, #tpu.memory_space<semaphore_mem>> -> memref<1x!tpu.dma_semaphore, #tpu.memory_space<semaphore_mem>>
      %54 = tpu.memref_squeeze %53 : memref<1x!tpu.dma_semaphore, #tpu.memory_space<semaphore_mem>> -> memref<!tpu.dma_semaphore, #tpu.memory_space<semaphore_mem>>
      tpu.wait_dma2 semaphore(%54 : memref<!tpu.dma_semaphore, #tpu.memory_space<semaphore_mem>>) src(%51 : memref<1x128xf32, #tpu.memory_space<any>>) dst(%52 : memref<1x128xf32, #tpu.memory_space<vmem>>)
      %c1_i32_38 = arith.constant 1 : i32
      %c0_i32_39 = arith.constant 0 : i32
      %55 = tpu.memref_slice %arg2[%16, %c0_i32_39] : memref<64x128xf32, #tpu.memory_space<any>> -> memref<1x128xf32, #tpu.memory_space<any>>
      %c1_i32_40 = arith.constant 1 : i32
      %c0_i32_41 = arith.constant 0 : i32
      %56 = tpu.memref_slice %arg12[%c1_i32_40, %c0_i32_41] : memref<8x128xf32, #tpu.memory_space<vmem>> -> memref<1x128xf32, #tpu.memory_space<vmem>>
      %57 = tpu.memref_slice %arg14[%c1_i32_38] : memref<8x!tpu.dma_semaphore, #tpu.memory_space<semaphore_mem>> -> memref<1x!tpu.dma_semaphore, #tpu.memory_space<semaphore_mem>>
      %58 = tpu.memref_squeeze %57 : memref<1x!tpu.dma_semaphore, #tpu.memory_space<semaphore_mem>> -> memref<!tpu.dma_semaphore, #tpu.memory_space<semaphore_mem>>
      tpu.wait_dma2 semaphore(%58 : memref<!tpu.dma_semaphore, #tpu.memory_space<semaphore_mem>>) src(%55 : memref<1x128xf32, #tpu.memory_space<any>>) dst(%56 : memref<1x128xf32, #tpu.memory_space<vmem>>)
      %c2_i32_42 = arith.constant 2 : i32
      %c0_i32_43 = arith.constant 0 : i32
      %59 = tpu.memref_slice %arg2[%21, %c0_i32_43] : memref<64x128xf32, #tpu.memory_space<any>> -> memref<1x128xf32, #tpu.memory_space<any>>
      %c2_i32_44 = arith.constant 2 : i32
      %c0_i32_45 = arith.constant 0 : i32
      %60 = tpu.memref_slice %arg12[%c2_i32_44, %c0_i32_45] : memref<8x128xf32, #tpu.memory_space<vmem>> -> memref<1x128xf32, #tpu.memory_space<vmem>>
      %61 = tpu.memref_slice %arg14[%c2_i32_42] : memref<8x!tpu.dma_semaphore, #tpu.memory_space<semaphore_mem>> -> memref<1x!tpu.dma_semaphore, #tpu.memory_space<semaphore_mem>>
      %62 = tpu.memref_squeeze %61 : memref<1x!tpu.dma_semaphore, #tpu.memory_space<semaphore_mem>> -> memref<!tpu.dma_semaphore, #tpu.memory_space<semaphore_mem>>
      tpu.wait_dma2 semaphore(%62 : memref<!tpu.dma_semaphore, #tpu.memory_space<semaphore_mem>>) src(%59 : memref<1x128xf32, #tpu.memory_space<any>>) dst(%60 : memref<1x128xf32, #tpu.memory_space<vmem>>)
      %c3_i32_46 = arith.constant 3 : i32
      %c0_i32_47 = arith.constant 0 : i32
      %63 = tpu.memref_slice %arg2[%26, %c0_i32_47] : memref<64x128xf32, #tpu.memory_space<any>> -> memref<1x128xf32, #tpu.memory_space<any>>
      %c3_i32_48 = arith.constant 3 : i32
      %c0_i32_49 = arith.constant 0 : i32
      %64 = tpu.memref_slice %arg12[%c3_i32_48, %c0_i32_49] : memref<8x128xf32, #tpu.memory_space<vmem>> -> memref<1x128xf32, #tpu.memory_space<vmem>>
      %65 = tpu.memref_slice %arg14[%c3_i32_46] : memref<8x!tpu.dma_semaphore, #tpu.memory_space<semaphore_mem>> -> memref<1x!tpu.dma_semaphore, #tpu.memory_space<semaphore_mem>>
      %66 = tpu.memref_squeeze %65 : memref<1x!tpu.dma_semaphore, #tpu.memory_space<semaphore_mem>> -> memref<!tpu.dma_semaphore, #tpu.memory_space<semaphore_mem>>
      tpu.wait_dma2 semaphore(%66 : memref<!tpu.dma_semaphore, #tpu.memory_space<semaphore_mem>>) src(%63 : memref<1x128xf32, #tpu.memory_space<any>>) dst(%64 : memref<1x128xf32, #tpu.memory_space<vmem>>)
      %c4_i32_50 = arith.constant 4 : i32
      %c0_i32_51 = arith.constant 0 : i32
      %67 = tpu.memref_slice %arg2[%31, %c0_i32_51] : memref<64x128xf32, #tpu.memory_space<any>> -> memref<1x128xf32, #tpu.memory_space<any>>
      %c4_i32_52 = arith.constant 4 : i32
      %c0_i32_53 = arith.constant 0 : i32
      %68 = tpu.memref_slice %arg12[%c4_i32_52, %c0_i32_53] : memref<8x128xf32, #tpu.memory_space<vmem>> -> memref<1x128xf32, #tpu.memory_space<vmem>>
      %69 = tpu.memref_slice %arg14[%c4_i32_50] : memref<8x!tpu.dma_semaphore, #tpu.memory_space<semaphore_mem>> -> memref<1x!tpu.dma_semaphore, #tpu.memory_space<semaphore_mem>>
      %70 = tpu.memref_squeeze %69 : memref<1x!tpu.dma_semaphore, #tpu.memory_space<semaphore_mem>> -> memref<!tpu.dma_semaphore, #tpu.memory_space<semaphore_mem>>
      tpu.wait_dma2 semaphore(%70 : memref<!tpu.dma_semaphore, #tpu.memory_space<semaphore_mem>>) src(%67 : memref<1x128xf32, #tpu.memory_space<any>>) dst(%68 : memref<1x128xf32, #tpu.memory_space<vmem>>)
      %c5_i32_54 = arith.constant 5 : i32
      %c0_i32_55 = arith.constant 0 : i32
      %71 = tpu.memref_slice %arg2[%36, %c0_i32_55] : memref<64x128xf32, #tpu.memory_space<any>> -> memref<1x128xf32, #tpu.memory_space<any>>
      %c5_i32_56 = arith.constant 5 : i32
      %c0_i32_57 = arith.constant 0 : i32
      %72 = tpu.memref_slice %arg12[%c5_i32_56, %c0_i32_57] : memref<8x128xf32, #tpu.memory_space<vmem>> -> memref<1x128xf32, #tpu.memory_space<vmem>>
      %73 = tpu.memref_slice %arg14[%c5_i32_54] : memref<8x!tpu.dma_semaphore, #tpu.memory_space<semaphore_mem>> -> memref<1x!tpu.dma_semaphore, #tpu.memory_space<semaphore_mem>>
      %74 = tpu.memref_squeeze %73 : memref<1x!tpu.dma_semaphore, #tpu.memory_space<semaphore_mem>> -> memref<!tpu.dma_semaphore, #tpu.memory_space<semaphore_mem>>
      tpu.wait_dma2 semaphore(%74 : memref<!tpu.dma_semaphore, #tpu.memory_space<semaphore_mem>>) src(%71 : memref<1x128xf32, #tpu.memory_space<any>>) dst(%72 : memref<1x128xf32, #tpu.memory_space<vmem>>)
      %c6_i32_58 = arith.constant 6 : i32
      %c0_i32_59 = arith.constant 0 : i32
      %75 = tpu.memref_slice %arg2[%41, %c0_i32_59] : memref<64x128xf32, #tpu.memory_space<any>> -> memref<1x128xf32, #tpu.memory_space<any>>
      %c6_i32_60 = arith.constant 6 : i32
      %c0_i32_61 = arith.constant 0 : i32
      %76 = tpu.memref_slice %arg12[%c6_i32_60, %c0_i32_61] : memref<8x128xf32, #tpu.memory_space<vmem>> -> memref<1x128xf32, #tpu.memory_space<vmem>>
      %77 = tpu.memref_slice %arg14[%c6_i32_58] : memref<8x!tpu.dma_semaphore, #tpu.memory_space<semaphore_mem>> -> memref<1x!tpu.dma_semaphore, #tpu.memory_space<semaphore_mem>>
      %78 = tpu.memref_squeeze %77 : memref<1x!tpu.dma_semaphore, #tpu.memory_space<semaphore_mem>> -> memref<!tpu.dma_semaphore, #tpu.memory_space<semaphore_mem>>
      tpu.wait_dma2 semaphore(%78 : memref<!tpu.dma_semaphore, #tpu.memory_space<semaphore_mem>>) src(%75 : memref<1x128xf32, #tpu.memory_space<any>>) dst(%76 : memref<1x128xf32, #tpu.memory_space<vmem>>)
      %c7_i32_62 = arith.constant 7 : i32
      %c0_i32_63 = arith.constant 0 : i32
      %79 = tpu.memref_slice %arg2[%46, %c0_i32_63] : memref<64x128xf32, #tpu.memory_space<any>> -> memref<1x128xf32, #tpu.memory_space<any>>
      %c7_i32_64 = arith.constant 7 : i32
      %c0_i32_65 = arith.constant 0 : i32
      %80 = tpu.memref_slice %arg12[%c7_i32_64, %c0_i32_65] : memref<8x128xf32, #tpu.memory_space<vmem>> -> memref<1x128xf32, #tpu.memory_space<vmem>>
      %81 = tpu.memref_slice %arg14[%c7_i32_62] : memref<8x!tpu.dma_semaphore, #tpu.memory_space<semaphore_mem>> -> memref<1x!tpu.dma_semaphore, #tpu.memory_space<semaphore_mem>>
      %82 = tpu.memref_squeeze %81 : memref<1x!tpu.dma_semaphore, #tpu.memory_space<semaphore_mem>> -> memref<!tpu.dma_semaphore, #tpu.memory_space<semaphore_mem>>
      tpu.wait_dma2 semaphore(%82 : memref<!tpu.dma_semaphore, #tpu.memory_space<semaphore_mem>>) src(%79 : memref<1x128xf32, #tpu.memory_space<any>>) dst(%80 : memref<1x128xf32, #tpu.memory_space<vmem>>)
      %c0_66 = arith.constant 0 : index
      %c0_67 = arith.constant 0 : index
      %83 = vector.load %arg12[%c0_66, %c0_67] : memref<8x128xf32, #tpu.memory_space<vmem>>, vector<8x128xf32>
      %c0_68 = arith.constant 0 : index
      %c0_69 = arith.constant 0 : index
      %84 = vector.load %arg3[%c0_68, %c0_69] : memref<8x128xf32, #tpu.memory_space<vmem>>, vector<8x128xf32>
      %85 = arith.truncf %83 : vector<8x128xf32> to vector<8x128xbf16>
      %c0_70 = arith.constant 0 : index
      %c0_71 = arith.constant 0 : index
      %86 = vector.load %arg4[%c0_70, %c0_71] : memref<128x384xbf16, #tpu.memory_space<vmem>>, vector<128x384xbf16>
      %cst_72 = arith.constant dense<0.000000e+00> : vector<8x384xf32>
      %87 = tpu.matmul %85, %86, %cst_72 {dimension_numbers = #tpu.dot_dimension_numbers<[1], [0], [0], [1], [0, 0, 1, 1], [], []>} : vector<8x128xbf16>, vector<128x384xbf16>, vector<8x384xf32> -> vector<8x384xf32>
      %c0_73 = arith.constant 0 : index
      %c0_74 = arith.constant 0 : index
      %88 = vector.load %arg6[%c0_73, %c0_74] : memref<1x384xf32, #tpu.memory_space<vmem>>, vector<1x384xf32>
      %89 = vector.broadcast %88 : vector<1x384xf32> to vector<8x384xf32>
      %90 = arith.addf %87, %89 : vector<8x384xf32>
      %c0_75 = arith.constant 0 : index
      %c0_76 = arith.constant 0 : index
      %91 = vector.load %arg5[%c0_75, %c0_76] : memref<128x384xf32, #tpu.memory_space<vmem>>, vector<128x384xf32>
      %cst_77 = arith.constant dense<0.000000e+00> : vector<8x384xf32>
      %92 = tpu.matmul %84, %91, %cst_77 {dimension_numbers = #tpu.dot_dimension_numbers<[1], [0], [0], [1], [0, 0, 1, 1], [], []>} : vector<8x128xf32>, vector<128x384xf32>, vector<8x384xf32> -> vector<8x384xf32>
      %c0_78 = arith.constant 0 : index
      %c0_79 = arith.constant 0 : index
      %93 = vector.load %arg7[%c0_78, %c0_79] : memref<1x384xf32, #tpu.memory_space<vmem>>, vector<1x384xf32>
      %94 = vector.broadcast %93 : vector<1x384xf32> to vector<8x384xf32>
      %95 = arith.addf %92, %94 : vector<8x384xf32>
      %96 = vector.extract_strided_slice %90 {offsets = [0, 0], sizes = [8, 128], strides = [1, 1]} : vector<8x384xf32> to vector<8x128xf32>
      %97 = vector.extract_strided_slice %95 {offsets = [0, 0], sizes = [8, 128], strides = [1, 1]} : vector<8x384xf32> to vector<8x128xf32>
      %98 = arith.addf %96, %97 : vector<8x128xf32>
      %99 = arith.negf %98 : vector<8x128xf32>
      %100 = math.exp %99 : vector<8x128xf32>
      %cst_80 = arith.constant 1.000000e+00 : f32
      %101 = vector.broadcast %cst_80 : f32 to vector<8x128xf32>
      %102 = arith.addf %101, %100 : vector<8x128xf32>
      %103 = arith.divf %101, %102 : vector<8x128xf32>
      %104 = vector.extract_strided_slice %90 {offsets = [0, 128], sizes = [8, 128], strides = [1, 1]} : vector<8x384xf32> to vector<8x128xf32>
      %105 = vector.extract_strided_slice %95 {offsets = [0, 128], sizes = [8, 128], strides = [1, 1]} : vector<8x384xf32> to vector<8x128xf32>
      %106 = arith.addf %104, %105 : vector<8x128xf32>
      %107 = arith.negf %106 : vector<8x128xf32>
      %108 = math.exp %107 : vector<8x128xf32>
      %cst_81 = arith.constant 1.000000e+00 : f32
      %109 = vector.broadcast %cst_81 : f32 to vector<8x128xf32>
      %110 = arith.addf %109, %108 : vector<8x128xf32>
      %111 = arith.divf %109, %110 : vector<8x128xf32>
      %112 = vector.extract_strided_slice %90 {offsets = [0, 256], sizes = [8, 128], strides = [1, 1]} : vector<8x384xf32> to vector<8x128xf32>
      %113 = vector.extract_strided_slice %95 {offsets = [0, 256], sizes = [8, 128], strides = [1, 1]} : vector<8x384xf32> to vector<8x128xf32>
      %114 = arith.mulf %103, %113 : vector<8x128xf32>
      %115 = arith.addf %112, %114 : vector<8x128xf32>
      %116 = math.tanh %115 : vector<8x128xf32>
      %cst_82 = arith.constant 1.000000e+00 : f32
      %117 = vector.broadcast %cst_82 : f32 to vector<8x128xf32>
      %118 = arith.subf %117, %111 : vector<8x128xf32>
      %119 = arith.mulf %118, %116 : vector<8x128xf32>
      %120 = arith.mulf %111, %84 : vector<8x128xf32>
      %121 = arith.addf %119, %120 : vector<8x128xf32>
      %122 = tpu.iota {dimensions = array<i32: 1>} : vector<8x128xi32>
      %c32_i32 = arith.constant 32 : i32
      %123 = vector.broadcast %c32_i32 : i32 to vector<8x128xi32>
      %124 = arith.cmpi slt, %122, %123 : vector<8x128xi32>
      %cst_83 = arith.constant 0.000000e+00 : f32
      %125 = vector.broadcast %cst_83 : f32 to vector<8x128xf32>
      %126 = arith.select %124, %121, %125 : vector<8x128xi1>, vector<8x128xf32>
      %c0_84 = arith.constant 0 : index
      %c0_85 = arith.constant 0 : index
      %127 = vector.load %arg13[%c0_84, %c0_85] : memref<8x128xf32, #tpu.memory_space<vmem>>, vector<8x128xf32>
      tpu.vector_store %arg13[%c0_84, %c0_85], %126 {strides = array<i32>} : memref<8x128xf32, #tpu.memory_space<vmem>>, vector<8x128xf32>,
      %c0_86 = arith.constant 0 : index
      %c0_87 = arith.constant 0 : index
      %128 = vector.load %arg11[%c0_86, %c0_87] : memref<8x128xf32, #tpu.memory_space<vmem>>, vector<8x128xf32>
      tpu.vector_store %arg11[%c0_86, %c0_87], %126 {strides = array<i32>} : memref<8x128xf32, #tpu.memory_space<vmem>>, vector<8x128xf32>,
    } else {
    }
    %c0 = arith.constant 0 : index
    %c0_1 = arith.constant 0 : index
    %3 = vector.load %arg13[%c0, %c0_1] : memref<8x128xf32, #tpu.memory_space<vmem>>, vector<8x128xf32>
    %4 = arith.truncf %3 : vector<8x128xf32> to vector<8x128xbf16>
    %c0_2 = arith.constant 0 : index
    %c0_3 = arith.constant 0 : index
    %5 = vector.load %arg8[%c0_2, %c0_3] : memref<128x128xbf16, #tpu.memory_space<vmem>>, vector<128x128xbf16>
    %cst = arith.constant dense<0.000000e+00> : vector<8x128xf32>
    %6 = tpu.matmul %4, %5, %cst {dimension_numbers = #tpu.dot_dimension_numbers<[1], [0], [0], [1], [0, 0, 1, 1], [], []>} : vector<8x128xbf16>, vector<128x128xbf16>, vector<8x128xf32> -> vector<8x128xf32>
    %c0_4 = arith.constant 0 : index
    %c0_5 = arith.constant 0 : index
    %7 = vector.load %arg9[%c0_4, %c0_5] : memref<1x128xf32, #tpu.memory_space<vmem>>, vector<1x128xf32>
    %8 = vector.broadcast %7 : vector<1x128xf32> to vector<8x128xf32>
    %9 = arith.addf %6, %8 : vector<8x128xf32>
    %c0_6 = arith.constant 0 : index
    %c0_7 = arith.constant 0 : index
    %10 = vector.load %arg10[%c0_6, %c0_7] : memref<8x128xf32, #tpu.memory_space<vmem>>, vector<8x128xf32>
    tpu.vector_store %arg10[%c0_6, %c0_7], %9 {strides = array<i32>} : memref<8x128xf32, #tpu.memory_space<vmem>>, vector<8x128xf32>,
    return
  }
  func.func @transform_1(%arg0: i32, %arg1: memref<8xi32, #tpu.memory_space<smem>>) -> (i32, i32) {
    %c0_i32 = arith.constant 0 : i32
    %c0_i32_0 = arith.constant 0 : i32
    %c0_i32_1 = arith.constant 0 : i32
    return %c0_i32, %c0_i32_0 : i32, i32
  }
  func.func @transform_2(%arg0: i32, %arg1: memref<8xi32, #tpu.memory_space<smem>>) -> (i32, i32) {
    %c0_i32 = arith.constant 0 : i32
    %c0_i32_0 = arith.constant 0 : i32
    %c0_i32_1 = arith.constant 0 : i32
    return %c0_i32, %c0_i32_0 : i32, i32
  }
  func.func @transform_3(%arg0: i32, %arg1: memref<8xi32, #tpu.memory_space<smem>>) -> (i32, i32) {
    %c0_i32 = arith.constant 0 : i32
    %c0_i32_0 = arith.constant 0 : i32
    %c0_i32_1 = arith.constant 0 : i32
    return %c0_i32, %c0_i32_0 : i32, i32
  }
  func.func @transform_4(%arg0: i32, %arg1: memref<8xi32, #tpu.memory_space<smem>>) -> (i32, i32) {
    %c0_i32 = arith.constant 0 : i32
    %c0_i32_0 = arith.constant 0 : i32
    %c0_i32_1 = arith.constant 0 : i32
    return %c0_i32, %c0_i32_0 : i32, i32
  }
  func.func @transform_5(%arg0: i32, %arg1: memref<8xi32, #tpu.memory_space<smem>>) -> (i32, i32) {
    %c0_i32 = arith.constant 0 : i32
    %c0_i32_0 = arith.constant 0 : i32
    %c0_i32_1 = arith.constant 0 : i32
    return %c0_i32, %c0_i32_0 : i32, i32
  }
  func.func @transform_6(%arg0: i32, %arg1: memref<8xi32, #tpu.memory_space<smem>>) -> (i32, i32) {
    %c0_i32 = arith.constant 0 : i32
    %c0_i32_0 = arith.constant 0 : i32
    return %c0_i32, %arg0 : i32, i32
  }
  func.func @transform_7(%arg0: i32, %arg1: memref<8xi32, #tpu.memory_space<smem>>) -> (i32, i32) {
    %c0_i32 = arith.constant 0 : i32
    %c0_i32_0 = arith.constant 0 : i32
    return %c0_i32, %arg0 : i32, i32
  }
  func.func @transform_8(%arg0: i32, %arg1: memref<8xi32, #tpu.memory_space<smem>>) -> (i32, i32) {
    %c0_i32 = arith.constant 0 : i32
    %c0_i32_0 = arith.constant 0 : i32
    return %c0_i32, %arg0 : i32, i32
  }
  func.func @transform_9(%arg0: i32, %arg1: memref<8xi32, #tpu.memory_space<smem>>) -> (i32, i32) {
    %c0_i32 = arith.constant 0 : i32
    %c0_i32_0 = arith.constant 0 : i32
    %c0_i32_1 = arith.constant 0 : i32
    return %c0_i32, %c0_i32_0 : i32, i32
  }
}

</mosaic_0001>

<bundles_post_ra>
// kernel: word_rnn_forward.1
= control target key start
LH: loop header
LB: loop body
LE: loop exit
PB: predicated region body
PF: predicated region fallthrough
CT: control target
= control target key end

     0   :  { %s1283_s16 = smov [#allocation6]   ;;  %s1499_s0 = inlined_call_operand.vmem [shape: s32[8], index: 0, kind: input, shape index: {}]   ;;  %s1500_s1 = inlined_call_operand.hbm [shape: f32[64,128], index: 1, kind: input, shape index: {}]   ;;  %s1501_s2 = inlined_call_operand.vmem [shape: f32[8,128], index: 2, kind: input, shape index: {}]   ;;  %s1502_s3 = inlined_call_operand.hbm [shape: bf16[128,384], index: 3, kind: input, shape index: {}]   ;;  %s1503_s4 = inlined_call_operand.hbm [shape: f32[128,384], index: 4, kind: input, shape index: {}]   ;;  %s1504_s5 = inlined_call_operand.vmem [shape: f32[1,384], index: 5, kind: input, shape index: {}]   ;;  %s1505_s6 = inlined_call_operand.vmem [shape: f32[1,384], index: 6, kind: input, shape index: {}]   ;;  %s1506_s7 = inlined_call_operand.hbm [shape: bf16[128,128], index: 7, kind: input, shape index: {}]   ;;  %s1507_s8 = inlined_call_operand.vmem [shape: f32[1,128], index: 8, kind: input, shape index: {}]   ;;  %s1508_s9 = inlined_call_operand.vmem [shape: f32[8,128], index: 9, kind: output, shape index: {0}]   ;;  %s1509_s10 = inlined_call_operand.vmem [shape: f32[8,128], index: 10, kind: output, shape index: {1}]  }
   0x1   :  { %s17_s15 = sshll.u32 %s1499_s0, 4  ;;  %s18_s15 = int_to_ptr.vmem [resolvable:$true] %s17_s15 }
   0x2   :  { %20 = dma.vmem_to_smem %s18_s15, 16, %s1283_s16, [#allocation5] }
   0x3   :  { %1261 = dma.done.wait [#allocation5], 16 }
   0x4   :  { %1262 = vsyncadd [#allocation5], 4294967280 }
   0x5   :  { %23 = sfence }
   0x6   :  { %24 = vsyncpa [#allocation8], 0 }
   0x7   :  { %25 = vsyncpa [#allocation10], 0  ;;  %s45_s19 = sshll.u32 %s1503_s4, 4  ;;  %s1284_s20 = smov [#allocation9]   ;;  %s46_s19 = int_to_ptr.hbm [resolvable:$true] %s45_s19 }
   0x8   :  { %s47_s21 = sshll.u32 %s1284_s20, 4  ;;  %s32_s0 = sshll.u32 %s1502_s3, 4  ;;  %s48_s21 = int_to_ptr.vmem [resolvable:$true] %s47_s21  ;;  %s33_s0 = int_to_ptr.hbm [resolvable:$true] %s32_s0 }
   0x9   :  { %s1285_s24 = smov 384   ;;  %s1286_s25 = smov 24  }
   0xa   :  { %53 = dma.hbm_to_vmem [thread:$0]  %s46_s19, 6144, %s48_s21, [#allocation10], %s1285_s24, %s1285_s24, %s1286_s25  }
   0xb   :  { %s1287_s26 = smov [#allocation7]   ;;  %s1288_s28 = smov 192  }
   0xc   :  { %s34_s27 = sshll.u32 %s1287_s26, 4  ;;  %s1289_s29 = smov 12   ;;  %s35_s27 = int_to_ptr.vmem [resolvable:$true] %s34_s27 }
   0xd   :  { %40 = dma.hbm_to_vmem [thread:$0]  %s33_s0, 3072, %s35_s27, [#allocation8], %s1288_s28, %s1288_s28, %s1289_s29  }
   0xe   :  { %s62_s11 = sshll.u32 %s1506_s7, 4  ;;  %s1290_s12 = smov [#allocation11]   ;;  %s63_s11 = int_to_ptr.hbm [resolvable:$true] %s62_s11 }
   0xf   :  { %s64_s13 = sshll.u32 %s1290_s12, 4  ;;  %s1291_s14 = smov 64   ;;  %s65_s13 = int_to_ptr.vmem [resolvable:$true] %s64_s13 }
  0x10   :  { %s1292_s3 = smov 4  }
  0x11   :  { %70 = dma.hbm_to_vmem [thread:$0]  %s63_s11, 1024, %s65_s13, [#allocation10], %s1291_s14, %s1291_s14, %s1292_s3  }
  0x12   :  { %1263 = dma.done.wait [#allocation8], 3072  }
  0x13   :  { %1264 = vsyncadd [#allocation8], 4294964224 }
  0x14   :  { %1265 = dma.done.wait [#allocation10], 7168  }
  0x15   :  { %1266 = vsyncadd [#allocation10], 4294960128  ;;  %s89_s15 = sld [smem:[#allocation6]]  ;;  %s1293_s16 = smov [#allocation2]  }
  0x16   :  { %s1368_s17 = sshll.u32 %s1293_s16, 4  ;;  %s776_s18 = sld [smem:[#allocation6 + $0x1]]  ;;  %s101_s17 = int_to_ptr.vmem [resolvable:$true] %s1368_s17 }
  0x17   :  { %s1294_s19 = smov [#allocation2 + $0x1]   ;;  %s1373_s20 = sld [smem:[#allocation6 + $0x2]] }
  0x18   :  { %s1371_s7 = sshll.u32 %s1294_s19, 4  ;;  %s1295_s21 = smov [#allocation2 + $0x2]   ;;  %s118_s7 = int_to_ptr.vmem [resolvable:$true] %s1371_s7 }
  0x19   :  { %s1376_s22 = sshll.u32 %s1295_s21, 4  ;;  %s1378_s23 = sld [smem:[#allocation6 + $0x3]]  ;;  %s135_s22 = int_to_ptr.vmem [resolvable:$true] %s1376_s22 }
  0x1a   :  { %s1296_s26 = smov [#allocation2 + $0x3]   ;;  %s1392_s16 = scalar_lea.hbm %s1500_s1, 64 }
  0x1b   :  { %s90_s25 = scalar_lea.hbm %s1500_s1, %s89_s15  ;;  %s1384_s27 = sshll.u32 %s1296_s26, 4  ;;  %s152_s27 = int_to_ptr.vmem [resolvable:$true] %s1384_s27 }
  0x1c   :  { %s98_s28 = sshll.u32 %s90_s25, 4  ;;  %s105_s4 = scalar_lea.hbm %s1500_s1, %s776_s18  ;;  %s99_s28 = int_to_ptr.hbm [resolvable:$true] %s98_s28 }
  0x1d   :  { %s115_s11 = sshll.u32 %s105_s4, 4  ;;  %s1069_s12 = sshra.s32 %s99_s28, 4  ;;  %s1070_s12 = int_to_ptr.hbm [resolvable:$true] %s1069_s12  ;;  %s116_s11 = int_to_ptr.hbm [resolvable:$true] %s115_s11 }
  0x1e   :  { %s1071_s13 = scalar_lea.hbm %s1070_s12, 1  ;;  %p1074_p1 = scmp.lt.s32.totalorder %s1070_s12, %s1500_s1 }
  0x1f   :  { %p1072_p0 = scmp.ne.s32.totalorder %s1070_s12, %s1071_s13  ;;  %p1075_p2 = scmp.lt.s32.totalorder %s1392_s16, %s1071_s13 }
  0x21   :  { %p1076_p3 = por %p1075_p2, %p1074_p1 }
  0x23   :  { %p1077_p4 = pnand %p1076_p3, %p1072_p0 }
  0x25   :  { %1080 = shalt.err (!%p1077_p4)  }
  0x26   :  { %103 = dma.hbm_to_vmem [thread:$0]  %s99_s28, 16, %s101_s17, [#allocation4] }
  0x27   :  { %s122_s0 = scalar_lea.hbm %s1500_s1, %s1373_s20  ;;  %s1093_s24 = sshra.s32 %s116_s11, 4  ;;  %s1094_s24 = int_to_ptr.hbm [resolvable:$true] %s1093_s24 }
  0x28   :  { %s1095_s25 = scalar_lea.hbm %s1094_s24, 1  ;;  %p1098_p6 = scmp.lt.s32.totalorder %s1094_s24, %s1500_s1 }
  0x29   :  { %p1096_p5 = scmp.ne.s32.totalorder %s1094_s24, %s1095_s25  ;;  %p1099_p7 = scmp.lt.s32.totalorder %s1392_s16, %s1095_s25 }
  0x2b   :  { %p1100_p8 = por %p1099_p7, %p1098_p6 }
  0x2d   :  { %p1101_p9 = pnand %p1100_p8, %p1096_p5 }
  0x2f   :  { %1104 = shalt.err (!%p1101_p9)  }
  0x30   :  { %120 = dma.hbm_to_vmem [thread:$0]  %s116_s11, 16, %s118_s7, [#allocation4 + $0x1] }
  0x31   :  { %s132_s17 = sshll.u32 %s122_s0, 4  ;;  %s139_s30 = scalar_lea.hbm %s1500_s1, %s1378_s23  ;;  %s133_s17 = int_to_ptr.hbm [resolvable:$true] %s132_s17 }
  0x32   :  { %s149_s4 = sshll.u32 %s139_s30, 4  ;;  %s1117_s12 = sshra.s32 %s133_s17, 4  ;;  %s1118_s12 = int_to_ptr.hbm [resolvable:$true] %s1117_s12  ;;  %s150_s4 = int_to_ptr.hbm [resolvable:$true] %s149_s4 }
  0x33   :  { %s1119_s13 = scalar_lea.hbm %s1118_s12, 1  ;;  %p1122_p11 = scmp.lt.s32.totalorder %s1118_s12, %s1500_s1 }
  0x34   :  { %p1120_p10 = scmp.ne.s32.totalorder %s1118_s12, %s1119_s13  ;;  %p1123_p12 = scmp.lt.s32.totalorder %s1392_s16, %s1119_s13 }
  0x36   :  { %p1124_p13 = por %p1123_p12, %p1122_p11 }
  0x38   :  { %p1125_p0 = pnand %p1124_p13, %p1120_p10 }
  0x3a   :  { %1128 = shalt.err (!%p1125_p0)  }
  0x3b   :  { %137 = dma.hbm_to_vmem [thread:$0]  %s133_s17, 16, %s135_s22, [#allocation4 + $0x2] }
  0x3c   :  { %s1141_s7 = sshra.s32 %s150_s4, 4  ;;  %s1142_s7 = int_to_ptr.hbm [resolvable:$true] %s1141_s7 }
  0x3d   :  { %s1143_s23 = scalar_lea.hbm %s1142_s7, 1  ;;  %p1146_p2 = scmp.lt.s32.totalorder %s1142_s7, %s1500_s1 }
  0x3e   :  { %p1144_p1 = scmp.ne.s32.totalorder %s1142_s7, %s1143_s23  ;;  %p1147_p3 = scmp.lt.s32.totalorder %s1392_s16, %s1143_s23 }
  0x40   :  { %p1148_p4 = por %p1147_p3, %p1146_p2 }
  0x42   :  { %p1149_p5 = pnand %p1148_p4, %p1144_p1 }
  0x44   :  { %1152 = shalt.err (!%p1149_p5)  }
  0x45   :  { %154 = dma.hbm_to_vmem [thread:$0]  %s150_s4, 16, %s152_s27, [#allocation4 + $0x3] }
  0x46   :  { %s779_s19 = sld [smem:[#allocation6 + $0x4]]  ;;  %s1297_s18 = smov [#allocation2 + $0x4]  }
  0x47   :  { %s168_s21 = sshll.u32 %s1297_s18, 4  ;;  %s780_s0 = sld [smem:[#allocation6 + $0x5]]  ;;  %s169_s21 = int_to_ptr.vmem [resolvable:$true] %s168_s21 }
  0x48   :  { %s1298_s22 = smov [#allocation2 + $0x5]   ;;  %s1425_s25 = sld [smem:[#allocation6 + $0x6]] }
  0x49   :  { %s1423_s24 = sshll.u32 %s1298_s22, 4  ;;  %s1299_s26 = smov [#allocation2 + $0x6]   ;;  %s186_s24 = int_to_ptr.vmem [resolvable:$true] %s1423_s24 }
  0x4a   :  { %s1428_s29 = sshll.u32 %s1299_s26, 4  ;;  %s1430_s17 = sld [smem:[#allocation6 + $0x7]]  ;;  %s203_s29 = int_to_ptr.vmem [resolvable:$true] %s1428_s29 }
  0x4c   :  { %s156_s20 = scalar_lea.hbm %s1500_s1, %s779_s19 }
  0x4d   :  { %s166_s30 = sshll.u32 %s156_s20, 4  ;;  %s173_s13 = scalar_lea.hbm %s1500_s1, %s780_s0  ;;  %s167_s30 = int_to_ptr.hbm [resolvable:$true] %s166_s30 }
  0x4e   :  { %s183_s14 = sshll.u32 %s173_s13, 4  ;;  %s1165_s3 = sshra.s32 %s167_s30, 4  ;;  %s1166_s3 = int_to_ptr.hbm [resolvable:$true] %s1165_s3  ;;  %s184_s14 = int_to_ptr.hbm [resolvable:$true] %s183_s14 }
  0x4f   :  { %s1167_s7 = scalar_lea.hbm %s1166_s3, 1  ;;  %p1170_p7 = scmp.lt.s32.totalorder %s1166_s3, %s1500_s1 }
  0x50   :  { %p1168_p6 = scmp.ne.s32.totalorder %s1166_s3, %s1167_s7  ;;  %p1171_p8 = scmp.lt.s32.totalorder %s1392_s16, %s1167_s7 }
  0x52   :  { %p1172_p9 = por %p1171_p8, %p1170_p7 }
  0x54   :  { %p1173_p10 = pnand %p1172_p9, %p1168_p6 }
  0x56   :  { %1176 = shalt.err (!%p1173_p10)  }
  0x57   :  { %171 = dma.hbm_to_vmem [thread:$0]  %s167_s30, 16, %s169_s21, [#allocation4 + $0x4] }
  0x58   :  { %s190_s18 = scalar_lea.hbm %s1500_s1, %s1425_s25  ;;  %s1189_s0 = sshra.s32 %s184_s14, 4  ;;  %s1190_s0 = int_to_ptr.hbm [resolvable:$true] %s1189_s0 }
  0x59   :  { %s1191_s22 = scalar_lea.hbm %s1190_s0, 1  ;;  %p1194_p12 = scmp.lt.s32.totalorder %s1190_s0, %s1500_s1 }
  0x5a   :  { %p1192_p11 = scmp.ne.s32.totalorder %s1190_s0, %s1191_s22  ;;  %p1195_p13 = scmp.lt.s32.totalorder %s1392_s16, %s1191_s22 }
  0x5c   :  { %p1196_p0 = por %p1195_p13, %p1194_p12 }
  0x5e   :  { %p1197_p1 = pnand %p1196_p0, %p1192_p11 }
  0x60   :  { %1200 = shalt.err (!%p1197_p1)  }
  0x61   :  { %188 = dma.hbm_to_vmem [thread:$0]  %s184_s14, 16, %s186_s24, [#allocation4 + $0x5] }
  0x62   :  { %s200_s21 = sshll.u32 %s190_s18, 4  ;;  %s207_s20 = scalar_lea.hbm %s1500_s1, %s1430_s17  ;;  %s201_s21 = int_to_ptr.hbm [resolvable:$true] %s200_s21 }
  0x63   :  { %s217_s30 = sshll.u32 %s207_s20, 4  ;;  %s1213_s4 = sshra.s32 %s201_s21, 4  ;;  %s1214_s4 = int_to_ptr.hbm [resolvable:$true] %s1213_s4  ;;  %s218_s30 = int_to_ptr.hbm [resolvable:$true] %s217_s30 }
  0x64   :  { %s1215_s12 = scalar_lea.hbm %s1214_s4, 1  ;;  %p1218_p3 = scmp.lt.s32.totalorder %s1214_s4, %s1500_s1 }
  0x65   :  { %p1216_p2 = scmp.ne.s32.totalorder %s1214_s4, %s1215_s12  ;;  %p1219_p4 = scmp.lt.s32.totalorder %s1392_s16, %s1215_s12 }
  0x67   :  { %p1220_p5 = por %p1219_p4, %p1218_p3 }
  0x69   :  { %p1221_p6 = pnand %p1220_p5, %p1216_p2 }
  0x6b   :  { %1224 = shalt.err (!%p1221_p6)  }
  0x6c   :  { %205 = dma.hbm_to_vmem [thread:$0]  %s201_s21, 16, %s203_s29, [#allocation4 + $0x6] }
  0x6d   :  { %s1300_s24 = smov [#allocation2 + $0x7]   ;;  %s1237_s14 = sshra.s32 %s218_s30, 4  ;;  %s1238_s14 = int_to_ptr.hbm [resolvable:$true] %s1237_s14 }
  0x6e   :  { %s219_s17 = sshll.u32 %s1300_s24, 4  ;;  %s1239_s7 = scalar_lea.hbm %s1238_s14, 1  ;;  %s220_s17 = int_to_ptr.vmem [resolvable:$true] %s219_s17 }
  0x6f   :  { %p1240_p7 = scmp.ne.s32.totalorder %s1238_s14, %s1239_s7  ;;  %p1242_p8 = scmp.lt.s32.totalorder %s1238_s14, %s1500_s1 }
  0x70   :  { %p1243_p9 = scmp.lt.s32.totalorder %s1392_s16, %s1239_s7 }
  0x72   :  { %p1244_p10 = por %p1243_p9, %p1242_p8 }
  0x74   :  { %p1245_p11 = pnand %p1244_p10, %p1240_p7 }
  0x76   :  { %1248 = shalt.err (!%p1245_p11)  }
  0x77   :  { %222 = dma.hbm_to_vmem [thread:$0]  %s218_s30, 16, %s220_s17, [#allocation4 + $0x7] }
  0x78   :  { %1267 = dma.done.wait [#allocation4], 16 }
  0x79   :  { %1268 = vsyncadd [#allocation4], 4294967280 }
  0x7a   :  { %1269 = dma.done.wait [#allocation4 + $0x1], 16 }
  0x7b   :  { %1270 = vsyncadd [#allocation4 + $0x1], 4294967280 }
  0x7c   :  { %1271 = dma.done.wait [#allocation4 + $0x2], 16 }
  0x7d   :  { %1272 = vsyncadd [#allocation4 + $0x2], 4294967280 }
  0x7e   :  { %1273 = dma.done.wait [#allocation4 + $0x3], 16 }
  0x7f   :  { %1274 = vsyncadd [#allocation4 + $0x3], 4294967280 }
  0x80   :  { %1275 = dma.done.wait [#allocation4 + $0x4], 16 }
  0x81   :  { %1276 = vsyncadd [#allocation4 + $0x4], 4294967280 }
  0x82   :  { %1277 = dma.done.wait [#allocation4 + $0x5], 16 }
  0x83   :  { %1278 = vsyncadd [#allocation4 + $0x5], 4294967280 }
  0x84   :  { %1279 = dma.done.wait [#allocation4 + $0x6], 16 }
  0x85   :  { %1280 = vsyncadd [#allocation4 + $0x6], 4294967280 }
  0x86   :  { %1281 = dma.done.wait [#allocation4 + $0x7], 16 }
  0x87   :  { %1282 = vsyncadd [#allocation4 + $0x7], 4294967280  ;;  %v877_v0 = vld [vmem:[#allocation7 + $0xb0] sm:$0xf]  ;;  %v944_v1 = vld [vmem:[#allocation7 + $0xb8] sm:$0xf0] }
  0x88   :  { %v869_v2 = vld [vmem:[#allocation7 + $0xa8] sm:$0xf]  ;;  %v878_v3 = vor.u32 %v944_v1, %v877_v0  ;;  %v943_v4 = vld [vmem:[#allocation7 + $0xb0] sm:$0xf0]  ;;  %v865_v5 = vld [vmem:[#allocation7 + $0x98] sm:$0xf] }
  0x89   :  { %v941_v6 = vld [vmem:[#allocation7 + $0xa0] sm:$0xf0]  ;;  %v870_v7 = vor.u32 %v943_v4, %v869_v2  ;;  %v857_v8 = vld [vmem:[#allocation7 + $0x90] sm:$0xf]  ;;  %v940_v9 = vld [vmem:[#allocation7 + $0x98] sm:$0xf0] }
  0x8a   :  { %437 = vmatpush.bf16.msra.mxu3 %v878_v3  ;;  %v866_v10 = vor.u32 %v941_v6, %v865_v5  ;;  %v858_v11 = vor.u32 %v940_v9, %v857_v8  ;;  %v853_v12 = vld [vmem:[#allocation7 + $0x80] sm:$0xf]  ;;  %v938_v13 = vld [vmem:[#allocation7 + $0x88] sm:$0xf0]  ;;  %v845_v14 = vld [vmem:[#allocation7 + $0x78] sm:$0xf] }
  0x8b   :  { %411 = vmatpush.bf16.msra.mxu0 %v870_v7  ;;  %v937_v15 = vld [vmem:[#allocation7 + $0x80] sm:$0xf0]  ;;  %v854_v16 = vor.u32 %v938_v13, %v853_v12  ;;  %v841_v18 = vld [vmem:[#allocation7 + $0x68] sm:$0xf]  ;;  %v935_v19 = vld [vmem:[#allocation7 + $0x70] sm:$0xf0] }
  0x8c   :  { %v846_v17 = vor.u32 %v937_v15, %v845_v14  ;;  %v833_v20 = vld [vmem:[#allocation7 + $0x60] sm:$0xf]  ;;  %v934_v21 = vld [vmem:[#allocation7 + $0x68] sm:$0xf0]  ;;  %v842_v22 = vor.u32 %v935_v19, %v841_v18  ;;  %v871_v24 = vld [vmem:[#allocation7 + $0xb4] sm:$0xf0] }
  0x8d   :  { %v942_v23 = vld [vmem:[#allocation7 + $0xac] sm:$0xf]  ;;  %v834_v25 = vor.u32 %v934_v21, %v833_v20  ;;  %v829_v26 = vld [vmem:[#allocation7 + $0x50] sm:$0xf]  ;;  %v932_v27 = vld [vmem:[#allocation7 + $0x58] sm:$0xf0] }
  0x8e   :  { %438 = vmatpush.bf16.msra.mxu3 %v866_v10  ;;  %v821_v28 = vld [vmem:[#allocation7 + $0x48] sm:$0xf]  ;;  %v874_v29 = vor.u32 %v942_v23, %v871_v24  ;;  %v931_v30 = vld [vmem:[#allocation7 + $0x50] sm:$0xf0]  ;;  %v859_v32 = vld [vmem:[#allocation7 + $0x9c] sm:$0xf0]  ;;  %v830_v34 = vor.u32 %v932_v27, %v829_v26 }
  0x8f   :  { %412 = vmatpush.bf16.msra.mxu0 %v858_v11  ;;  %v939_v31 = vld [vmem:[#allocation7 + $0x94] sm:$0xf]  ;;  %v936_v35 = vld [vmem:[#allocation7 + $0x7c] sm:$0xf]  ;;  %v847_v36 = vld [vmem:[#allocation7 + $0x84] sm:$0xf0]  ;;  %v822_v37 = vor.u32 %v931_v30, %v821_v28 }
  0x90   :  { %424 = vmatpush.bf16.msra.mxu1 %v874_v29  ;;  %v862_v33 = vor.u32 %v939_v31, %v859_v32  ;;  %v817_v38 = vld [vmem:[#allocation7 + $0x38] sm:$0xf]  ;;  %v929_v39 = vld [vmem:[#allocation7 + $0x40] sm:$0xf0]  ;;  %v809_v40 = vld [vmem:[#allocation7 + $0x30] sm:$0xf]  ;;  %v850_v42 = vor.u32 %v936_v35, %v847_v36 }
  0x91   :  { %v928_v41 = vld [vmem:[#allocation7 + $0x38] sm:$0xf0]  ;;  %v818_v43 = vor.u32 %v929_v39, %v817_v38  ;;  %v933_v44 = vld [vmem:[#allocation7 + $0x64] sm:$0xf]  ;;  %v835_v45 = vld [vmem:[#allocation7 + $0x6c] sm:$0xf0] }
  0x92   :  { %439 = vmatpush.bf16.msra.mxu3 %v854_v16  ;;  %v810_v46 = vor.u32 %v928_v41, %v809_v40  ;;  %v805_v47 = vld [vmem:[#allocation7 + $0x20] sm:$0xf]  ;;  %v926_v48 = vld [vmem:[#allocation7 + $0x28] sm:$0xf0]  ;;  %v797_v49 = vld [vmem:[#allocation7 + $0x18] sm:$0xf]  ;;  %v838_v51 = vor.u32 %v933_v44, %v835_v45 }
  0x93   :  { %413 = vmatpush.bf16.msra.mxu0 %v846_v17  ;;  %v925_v50 = vld [vmem:[#allocation7 + $0x20] sm:$0xf0]  ;;  %v806_v52 = vor.u32 %v926_v48, %v805_v47  ;;  %v930_v53 = vld [vmem:[#allocation7 + $0x4c] sm:$0xf]  ;;  %v823_v54 = vld [vmem:[#allocation7 + $0x54] sm:$0xf0] }
  0x94   :  { %425 = vmatpush.bf16.msra.mxu1 %v862_v33  ;;  %v798_v55 = vor.u32 %v925_v50, %v797_v49  ;;  %v793_v56 = vld [vmem:[#allocation7 + $0x8] sm:$0xf]  ;;  %v923_v57 = vld [vmem:[#allocation7 + $0x10] sm:$0xf0]  ;;  %v785_v58 = vld [vmem:[#allocation7] sm:$0xf]  ;;  %v826_v60 = vor.u32 %v930_v53, %v823_v54 }
  0x95   :  { %v922_v59 = vld [vmem:[#allocation7 + $0x8] sm:$0xf0]  ;;  %v794_v61 = vor.u32 %v923_v57, %v793_v56  ;;  %v927_v62 = vld [vmem:[#allocation7 + $0x34] sm:$0xf]  ;;  %v811_v63 = vld [vmem:[#allocation7 + $0x3c] sm:$0xf0] }
  0x96   :  { %440 = vmatpush.bf16.msra.mxu3 %v842_v22  ;;  %v786_v0 = vor.u32 %v922_v59, %v785_v58  ;;  %v240_v1 = vld [vmem:[#allocation2] sm:$0xff]  ;;  %v495_v2 = vld [vmem:[#allocation9 + $0x168] sm:$0xff]  ;;  %v496_v3 = vld [vmem:[#allocation9 + $0x170] sm:$0xff]  ;;  %v814_v4 = vor.u32 %v927_v62, %v811_v63 }
  0x97   :  { %414 = vmatpush.bf16.msra.mxu0 %v834_v25  ;;  %v492_v5 = vld [vmem:[#allocation9 + $0x150] sm:$0xff]  ;;  %v242_v6 = vpack.c.bf16 %v240_v1, %v240_v1  ;;  %v924_v7 = vld [vmem:[#allocation7 + $0x1c] sm:$0xf]  ;;  %v799_v8 = vld [vmem:[#allocation7 + $0x24] sm:$0xf0] }
  0x98   :  { %426 = vmatpush.bf16.msra.mxu1 %v850_v42  ;;  %v493_v9 = vld [vmem:[#allocation9 + $0x158] sm:$0xff]  ;;  %v490_v11 = vld [vmem:[#allocation9 + $0x140] sm:$0xff]  ;;  %v802_v12 = vor.u32 %v924_v7, %v799_v8  ;;  %v787_v15 = vld [vmem:[#allocation7 + $0xc] sm:$0xf0] }
  0x99   :  { %v489_v10 = vld [vmem:[#allocation9 + $0x138] sm:$0xff]  ;;  %v486_v13 = vld [vmem:[#allocation9 + $0x120] sm:$0xff]  ;;  %v487_v16 = vld [vmem:[#allocation9 + $0x128] sm:$0xff] }
  0x9a   :  { %441 = vmatpush.bf16.msra.mxu3 %v830_v34  ;;  %v921_v14 = vld [vmem:[#allocation7 + $0x4] sm:$0xf]  ;;  %v483_v17 = vld [vmem:[#allocation9 + $0x108] sm:$0xff]  ;;  %v484_v18 = vld [vmem:[#allocation9 + $0x110] sm:$0xff] }
  0x9b   :  { %415 = vmatpush.bf16.msra.mxu0 %v822_v37  ;;  %v790_v19 = vor.u32 %v921_v14, %v787_v15  ;;  %v480_v20 = vld [vmem:[#allocation9 + $0xf0] sm:$0xff]  ;;  %v481_v21 = vld [vmem:[#allocation9 + $0xf8] sm:$0xff]  ;;  %v478_v24 = vld [vmem:[#allocation9 + $0xe0] sm:$0xff] }
  0x9c   :  { %427 = vmatpush.bf16.msra.mxu1 %v838_v51  ;;  %v497_v22 = vld [vmem:[#allocation9 + $0x178] sm:$0xff]  ;;  %v474_v25 = vld [vmem:[#allocation9 + $0xc0] sm:$0xff]  ;;  %v475_v27 = vld [vmem:[#allocation9 + $0xc8] sm:$0xff] }
  0x9d   :  { %v477_v23 = vld [vmem:[#allocation9 + $0xd8] sm:$0xff]  ;;  %v494_v26 = vld [vmem:[#allocation9 + $0x160] sm:$0xff]  ;;  %v471_v28 = vld [vmem:[#allocation9 + $0xa8] sm:$0xff] }
  0x9e   :  { %442 = vmatpush.bf16.msra.mxu3 %v818_v43  ;;  %v491_v29 = vld [vmem:[#allocation9 + $0x148] sm:$0xff]  ;;  %v472_v30 = vld [vmem:[#allocation9 + $0xb0] sm:$0xff]  ;;  %v469_v33 = vld [vmem:[#allocation9 + $0x98] sm:$0xff] }
  0x9f   :  { %416 = vmatpush.bf16.msra.mxu0 %v810_v46  ;;  %v468_v31 = vld [vmem:[#allocation9 + $0x90] sm:$0xff]  ;;  %v465_v34 = vld [vmem:[#allocation9 + $0x78] sm:$0xff]  ;;  %v466_v36 = vld [vmem:[#allocation9 + $0x80] sm:$0xff] }
  0xa0   :  { %428 = vmatpush.bf16.msra.mxu1 %v826_v60  ;;  %v488_v32 = vld [vmem:[#allocation9 + $0x130] sm:$0xff]  ;;  %v485_v35 = vld [vmem:[#allocation9 + $0x118] sm:$0xff]  ;;  %v462_v37 = vld [vmem:[#allocation9 + $0x60] sm:$0xff] }
  0xa1   :  { %v482_v38 = vld [vmem:[#allocation9 + $0x100] sm:$0xff]  ;;  %v463_v39 = vld [vmem:[#allocation9 + $0x68] sm:$0xff]  ;;  %v460_v42 = vld [vmem:[#allocation9 + $0x50] sm:$0xff] }
  0xa2   :  { %443 = vmatpush.bf16.msra.mxu3 %v806_v52  ;;  %v459_v40 = vld [vmem:[#allocation9 + $0x48] sm:$0xff]  ;;  %v456_v43 = vld [vmem:[#allocation9 + $0x30] sm:$0xff]  ;;  %v457_v45 = vld [vmem:[#allocation9 + $0x38] sm:$0xff] }
  0xa3   :  { %417 = vmatpush.bf16.msra.mxu0 %v798_v55  ;;  %v479_v41 = vld [vmem:[#allocation9 + $0xe8] sm:$0xff]  ;;  %v476_v44 = vld [vmem:[#allocation9 + $0xd0] sm:$0xff]  ;;  %v453_v46 = vld [vmem:[#allocation9 + $0x18] sm:$0xff] }
  0xa4   :  { %429 = vmatpush.bf16.msra.mxu1 %v814_v4  ;;  %v473_v47 = vld [vmem:[#allocation9 + $0xb8] sm:$0xff]  ;;  %v454_v48 = vld [vmem:[#allocation9 + $0x20] sm:$0xff]  ;;  %v451_v52 = vld [vmem:[#allocation9 + $0x8] sm:$0xff] }
  0xa5   :  { %v450_v49 = vld [vmem:[#allocation9] sm:$0xff]  ;;  %v1470_v51 = vld [vmem:[%s1501_s2] sm:$0xff]  ;;  %v467_v53 = vld [vmem:[#allocation9 + $0x88] sm:$0xff] }
  0xa6   :  { %444 = vmatpush.bf16.msra.mxu3 %v794_v61  ;;  %v470_v50 = vld [vmem:[#allocation9 + $0xa0] sm:$0xff]  ;;  %v464_v54 = vld [vmem:[#allocation9 + $0x70] sm:$0xff]  ;;  %v461_v55 = vld [vmem:[#allocation9 + $0x58] sm:$0xff] }
  0xa7   :  { %418 = vmatpush.bf16.msra.mxu0 %v786_v0  ;;  %v458_v56 = vld [vmem:[#allocation9 + $0x40] sm:$0xff]  ;;  %v455_v57 = vld [vmem:[#allocation9 + $0x28] sm:$0xff]  ;;  %v452_v58 = vld [vmem:[#allocation9 + $0x10] sm:$0xff] }
  0xa8   :  { %430 = vmatpush.bf16.msra.mxu1 %v802_v12  ;;  %v952_v1 = vld [vmem:[#allocation11 + $0x38] sm:$0xff] }
  0xa9   :  { %445 = vmatmul.bf16.vlgmr.msra.gmra.mxu3 %v242_v6  ;;  %689 = vmatpush.bf16.msra.mxu2 %v952_v1  ;;  %v498_v4 = vld [vmem:[%s1505_s6] sm:$0x7] }
  0xaa   :  { %506 = vmatpush.msrb.mxu3 %v495_v2  ;;  %419 = vmatmul.bf16.vlgmr.msra.gmra.mxu0 %v242_v6  ;;  %v951_v2 = vld [vmem:[#allocation11 + $0x30] sm:$0xff]  ;;  %v501_v7 = vperm.slane %v498_v4, 1  ;;  %v500_v12 = vperm.slane %v498_v4, 0 }
  0xab   :  { %526 = vmatpush.msrb.mxu0 %v496_v3  ;;  %v1480_v3 = vld [vmem:[%s1504_s5] sm:$0x7] }
  0xac   :  { %507 = vmatpush.msrb.mxu3 %v492_v5  ;;  %431 = vmatpush.bf16.msra.mxu1 %v790_v19  ;;  %v278_v5 = vperm.slane %v1480_v3, 1  ;;  %v948_v19 = vld [vmem:[#allocation11 + $0x18] sm:$0xff] }
  0xad   :  { %527 = vmatpush.msrb.mxu0 %v493_v9  ;;  %690 = vmatpush.bf16.msra.mxu2 %v951_v2  ;;  %v974_v2 = vld [vmem:[%s1507_s8] ss:$0 sm:$0xff] }
  0xae   :  { %508 = vmatpush.msrb.mxu3 %v489_v10 }
  0xaf   :  { %528 = vmatpush.msrb.mxu0 %v490_v11  ;;  %432 = vmatmul.bf16.vlgmr.msra.gmra.mxu1 %v242_v6  ;;  %v950_v6 = vld [vmem:[#allocation11 + $0x28] sm:$0xff]  ;;  %v277_v11 = vperm.slane %v1480_v3, 0 }
  0xb0   :  { %509 = vmatpush.msrb.mxu3 %v486_v13  ;;  %546 = vmatpush.msrb.mxu1 %v497_v22  ;;  %v949_v13 = vld [vmem:[#allocation11 + $0x20] sm:$0xff]  ;;  %v947_v22 = vld [vmem:[#allocation11 + $0x10] sm:$0xff] }
  0xb1   :  { %529 = vmatpush.msrb.mxu0 %v487_v16  ;;  %691 = vmatpush.bf16.msra.mxu2 %v950_v6 }
  0xb2   :  { %510 = vmatpush.msrb.mxu3 %v483_v17  ;;  %547 = vmatpush.msrb.mxu1 %v494_v26  ;;  %v945_v26 = vld [vmem:[#allocation11] sm:$0xff] }
  0xb3   :  { %530 = vmatpush.msrb.mxu0 %v484_v18 }
  0xb4   :  { %511 = vmatpush.msrb.mxu3 %v480_v20  ;;  %548 = vmatpush.msrb.mxu1 %v491_v29 }
  0xb5   :  { %531 = vmatpush.msrb.mxu0 %v481_v21  ;;  %692 = vmatpush.bf16.msra.mxu2 %v949_v13 }
  0xb6   :  { %512 = vmatpush.msrb.mxu3 %v477_v23  ;;  %549 = vmatpush.msrb.mxu1 %v488_v32  ;;  %v946_v23 = vld [vmem:[#allocation11 + $0x8] sm:$0xff] }
  0xb7   :  { %532 = vmatpush.msrb.mxu0 %v478_v24 }
  0xb8   :  { %513 = vmatpush.msrb.mxu3 %v474_v25  ;;  %550 = vmatpush.msrb.mxu1 %v485_v35 }
  0xb9   :  { %533 = vmatpush.msrb.mxu0 %v475_v27  ;;  %693 = vmatpush.bf16.msra.mxu2 %v948_v19 }
  0xba   :  { %514 = vmatpush.msrb.mxu3 %v471_v28  ;;  %551 = vmatpush.msrb.mxu1 %v482_v38 }
  0xbb   :  { %534 = vmatpush.msrb.mxu0 %v472_v30 }
  0xbc   :  { %515 = vmatpush.msrb.mxu3 %v468_v31  ;;  %552 = vmatpush.msrb.mxu1 %v479_v41  ;;  %v279_v41 = vperm.slane %v1480_v3, 2 }
  0xbd   :  { %535 = vmatpush.msrb.mxu0 %v469_v33  ;;  %694 = vmatpush.bf16.msra.mxu2 %v947_v22 }
  0xbe   :  { %516 = vmatpush.msrb.mxu3 %v465_v34  ;;  %553 = vmatpush.msrb.mxu1 %v476_v44  ;;  %v502_v34 = vperm.slane %v498_v4, 2 }
  0xbf   :  { %536 = vmatpush.msrb.mxu0 %v466_v36 }
  0xc0   :  { %517 = vmatpush.msrb.mxu3 %v462_v37  ;;  %554 = vmatpush.msrb.mxu1 %v473_v47 }
  0xc1   :  { %537 = vmatpush.msrb.mxu0 %v463_v39  ;;  %695 = vmatpush.bf16.msra.mxu2 %v946_v23 }
  0xc2   :  { %518 = vmatpush.msrb.mxu3 %v459_v40  ;;  %555 = vmatpush.msrb.mxu1 %v470_v50 }
  0xc3   :  { %538 = vmatpush.msrb.mxu0 %v460_v42 }
  0xc4   :  { %519 = vmatpush.msrb.mxu3 %v456_v43  ;;  %556 = vmatpush.msrb.mxu1 %v467_v53 }
  0xc5   :  { %539 = vmatpush.msrb.mxu0 %v457_v45  ;;  %696 = vmatpush.bf16.msra.mxu2 %v945_v26 }
  0xc6   :  { %520 = vmatpush.msrb.mxu3 %v453_v46  ;;  %557 = vmatpush.msrb.mxu1 %v464_v54 }
  0xc7   :  { %540 = vmatpush.msrb.mxu0 %v454_v48 }
  0xc8   :  { %521 = vmatpush.msrb.mxu3 %v450_v49  ;;  %558 = vmatpush.msrb.mxu1 %v461_v55 }
  0xc9   :  { %522 = vmatmul.f32.vlgmr.msrb.gmra.mxu3 %v1470_v51  ;;  %541 = vmatpush.msrb.mxu0 %v451_v52 }
  0xca   :  { %542 = vmatmul.f32.vlgmr.msrb.gmra.mxu0 %v1470_v51  ;;  %559 = vmatpush.msrb.mxu1 %v458_v56  ;;  %v613_v56 = vlaneseq }
  0xcc   :  { %560 = vmatpush.msrb.mxu1 %v455_v57 }
  0xce   :  { %561 = vmatpush.msrb.mxu1 %v452_v58  ;;  %v614_v58 = vand.u32 127, %v613_v56 }
  0xcf   :  { %562 = vmatmul.f32.vlgmr.msrb.gmra.mxu1 %v1470_v51 }
  0xd0   :  { %vm615_vm8 = vcmp.lt.s32.totalorder %v614_v58, 32 }
  0xd1   :  { %vm953_vm9 = vmpackc.low %vm615_vm8, %vm615_vm8 }
 0x127   :  { %v420_v59 = vpop.f32.mrf.mxu0 }
 0x128   :  { %v421_v17 = vadd.f32 %v420_v59, %v277_v11 }
 0x12c   :  { %v1475_v60 = vpop.f32.mrf.mxu3  ;;  %v433_v62 = vpop.f32.mrf.mxu1 }
 0x12d   :  { %v434_v8 = vadd.f32 %v433_v62, %v278_v5  ;;  %v447_v50 = vadd.f32 %v1475_v60, %v279_v41 }
 0x12f   :  { %v422_v61 = vpop.f32.mrf.mxu0 }
 0x134   :  { %v448_v63 = vpop.f32.mrf.mxu3  ;;  %v435_v0 = vpop.f32.mrf.mxu1 }
 0x147   :  { %v543_v9 = vpop.f32.mrf.mxu0 }
 0x148   :  { %v544_v10 = vadd.f32 %v543_v9, %v501_v7 }
 0x14a   :  { %v586_v14 = vadd.f32 %v544_v10, %v434_v8 }
 0x14c   :  { %v880_v15 = vmul.f32 -1.442695, %v586_v14  ;;  %v523_v16 = vpop.f32.mrf.mxu3  ;;  %v563_v36 = vpop.f32.mrf.mxu1 }
 0x14d   :  { %v524_v18 = vadd.f32 %v523_v16, %v500_v12  ;;  %v564_v42 = vadd.f32 %v563_v36, %v502_v34 }
 0x14e   :  { %975 = vpow2.f32 %v880_v15 }
 0x14f   :  { %v566_v20 = vadd.f32 %v524_v18, %v421_v17 }
 0x151   :  { %v879_v21 = vmul.f32 -1.442695, %v566_v20 }
 0x153   :  { %977 = vpow2.f32 %v879_v21 }
 0x154   :  { %v976_v24 = vpop.eup %975 }
 0x155   :  { %v590_v25 = vadd.f32 1.0, %v976_v24 }
 0x157   :  { %979 = vrcp.f32 %v590_v25  ;;  %vm596_vm3 = vweird.f32 %v590_v25  ;;  %v602_v46 = vand.u32 2147483648, %v590_v25  ;;  %v600_v49 = vand.u32 2147483647, %v590_v25 }
 0x159   :  { %v978_v27 = vpop.eup %977  ;;  %v603_v54 = vor.u32 1.1754944e-38, %v602_v46  ;;  %vm601_vm7 = vcmp.eq.f32.partialorder %v600_v49, 8.507059e+37 }
 0x15a   :  { %v570_v28 = vadd.f32 1.0, %v978_v27 }
 0x15c   :  { %981 = vrcp.f32 %v570_v28  ;;  %v582_v37 = vand.u32 2147483648, %v570_v28  ;;  %v580_v39 = vand.u32 2147483647, %v570_v28  ;;  %vm576_vm1 = vweird.f32 %v570_v28 }
 0x15d   :  { %v980_v29 = vpop.eup %979 }
 0x15e   :  { %v592_v30 = vmul.f32 %v980_v29, %v590_v25  ;;  %v583_v44 = vor.u32 1.1754944e-38, %v582_v37  ;;  %vm597_vm4 = vweird.f32 %v980_v29  ;;  %vm581_vm5 = vcmp.eq.f32.partialorder %v580_v39, 8.507059e+37 }
 0x15f   :  { %vm598_vm6 = vmor %vm596_vm3, %vm597_vm4 }
 0x160   :  { %v593_v33 = vsub.f32 1.0, %v592_v30 }
 0x162   :  { %v982_v31 = vpop.eup %981  ;;  %v594_v40 = vmul.f32 %v980_v29, %v593_v33 }
 0x163   :  { %v572_v32 = vmul.f32 %v982_v31, %v570_v28  ;;  %vm577_vm0 = vweird.f32 %v982_v31 }
 0x164   :  { %vm578_vm2 = vmor %vm576_vm1, %vm577_vm0  ;;  %v595_v48 = vadd.f32 %v980_v29, %v594_v40 }
 0x165   :  { %v573_v35 = vsub.f32 1.0, %v572_v32 }
 0x166   :  { %v599_v55 = vsel %vm598_vm6, %v980_v29, %v595_v48 }
 0x167   :  { %v574_v38 = vmul.f32 %v982_v31, %v573_v35  ;;  %v604_v57 = vsel %vm601_vm7, %v603_v54, %v599_v55 }
 0x168   :  { %v609_v59 = vsub.f32 1.0, %v604_v57  ;;  %v611_v63 = vmul.f32 %v604_v57, %v1470_v51 }
 0x169   :  { %v575_v43 = vadd.f32 %v982_v31, %v574_v38 }
 0x16b   :  { %v579_v45 = vsel %vm578_vm2, %v982_v31, %v575_v43 }
 0x16c   :  { %v584_v47 = vsel %vm581_vm5, %v583_v44, %v579_v45 }
 0x16d   :  { %v606_v52 = vmul.f32 %v584_v47, %v564_v42 }
 0x16f   :  { %v607_v53 = vadd.f32 %v606_v52, %v447_v50 }
 0x171   :  { %983 = vtanh.f32 %v607_v53 }
 0x177   :  { %v984_v61 = vpop.eup %983 }
 0x178   :  { %v610_v62 = vmul.f32 %v984_v61, %v609_v59 }
 0x17a   :  { %v612_v0 = vadd.f32 %v611_v63, %v610_v62 }
 0x17c   :  { %v616_v1 = vsel %vm615_vm8, %v612_v0, 0.0  ;;  %v954_v60 = vpack.c.bf16 %v612_v0, %v612_v0 }
 0x17d   :  { %618 = vst [vmem:[%s1509_s10] sm:$0xff] %v616_v1 }
 0x17e   :  { %955 = vmatmul.msk.bf16.vlgmr.msra.gmra.mxu2 %vm953_vm9, %v954_v60 }
 0x201   :  { %v698_v3 = vpop.f32.mrf.mxu2 }
 0x202   :  { %v699_v4 = vadd.f32 %v974_v2, %v698_v3 }
 0x204   :  { %702 = vst [vmem:[%s1508_s9] sm:$0xff] %v699_v4 }
 0x209   :  { %v700_v51 = vpop.f32.mrf.mxu2 }
 0x20a   :  { %711 = vsyncpa [#allocation8], 1 }
 0x20b   :  { %712 = vsyncpa [#allocation10], 1 }
 0x20c   :  { %713 = vsyncmov [#allocation4] }
 0x20f   :  { %s714_s27 = vpop.sfrf %713 }
 0x210   :  { %p913_p12 = scmp.ne.s32.totalorder %s714_s27, 0 }
 0x212   :  { %718 = shalt.err (%p913_p12)  }
 0x213   :  { %720 = vsyncmov [#allocation4 + $0x1] }
 0x216   :  { %s721_s10 = vpop.sfrf %720 }
 0x217   :  { %p914_p13 = scmp.ne.s32.totalorder %s721_s10, 0 }
 0x219   :  { %725 = shalt.err (%p914_p13)  }
 0x21a   :  { %727 = vsyncmov [#allocation4 + $0x2] }
 0x21d   :  { %s728_s21 = vpop.sfrf %727 }
 0x21e   :  { %p915_p0 = scmp.ne.s32.totalorder %s728_s21, 0 }
 0x220   :  { %732 = shalt.err (%p915_p0)  }
 0x221   :  { %734 = vsyncmov [#allocation4 + $0x3] }
 0x224   :  { %s735_s8 = vpop.sfrf %734 }
 0x225   :  { %p916_p1 = scmp.ne.s32.totalorder %s735_s8, 0 }
 0x227   :  { %739 = shalt.err (%p916_p1)  }
 0x228   :  { %741 = vsyncmov [#allocation4 + $0x4] }
 0x22b   :  { %s742_s9 = vpop.sfrf %741 }
 0x22c   :  { %p917_p2 = scmp.ne.s32.totalorder %s742_s9, 0 }
 0x22e   :  { %746 = shalt.err (%p917_p2)  }
 0x22f   :  { %748 = vsyncmov [#allocation4 + $0x5] }
 0x232   :  { %s749_s28 = vpop.sfrf %748 }
 0x233   :  { %p918_p3 = scmp.ne.s32.totalorder %s749_s28, 0 }
 0x235   :  { %753 = shalt.err (%p918_p3)  }
 0x236   :  { %755 = vsyncmov [#allocation4 + $0x6] }
 0x239   :  { %s756_s25 = vpop.sfrf %755 }
 0x23a   :  { %p919_p4 = scmp.ne.s32.totalorder %s756_s25, 0 }
 0x23c   :  { %760 = shalt.err (%p919_p4)  }
 0x23d   :  { %762 = vsyncmov [#allocation4 + $0x7] }
 0x240   :  { %s763_s20 = vpop.sfrf %762 }
 0x241   :  { %p920_p5 = scmp.ne.s32.totalorder %s763_s20, 0 }
 0x243   :  { %767 = shalt.err (%p920_p5)  }

</bundles_post_ra>
